<compile_context>
chip_gen: v7x
topology: tpu7x:2x2x1
jax: 0.10.0
libtpu: 0.0.40
codegen_flags: <defaults>
</compile_context>

<pallas_src>
import functools

import jax
import jax.numpy as jnp
from jax import lax
from jax.experimental import pallas as pl
from jax.experimental.pallas import tpu as pltpu


# ----------------------------- Pallas kernel -------------------------------- #

def make_fused_qlstm_kernel(n_layers, T, Bp, hids, drops):
    """Fully fused multi-layer QLSTM forward.

    Kernel ref layout (positional):
      x_ref                       (T*Bp, D)            padded input, flattened over time
      W0_ref                      (D, 4*H0)            layer-0 fused input weights [f|i|o|c]
      b0_ref                      (1, 4*H0)            layer-0 fused bias
      U0_ref                      (H0, 4*H0)           layer-0 fused recurrent weights
      WU_ref[l-1], l=1..n-1       (H_{l-1}+H_l, 4*H_l) fused [input; recurrent] weights
      b_ref[l-1],  l=1..n-1       (1, 4*H_l)
      out_ref                     (T, Bp, H_{n-1})
      scratch: wx0_ref            (T*Bp, 4*H0)         hoisted layer-0 projections
    """
    n = n_layers

    def kernel(*refs):
        x_ref = refs[0]
        w0_ref, b0_ref, u0_ref = refs[1], refs[2], refs[3]
        wu_refs = refs[4:4 + (n - 1)]
        b_refs = refs[4 + (n - 1):4 + 2 * (n - 1)]
        out_ref = refs[4 + 2 * (n - 1)]
        wx0_ref = refs[4 + 2 * (n - 1) + 1]

        # ---- Hoisted layer-0 input projection: one big lane-dense matmul. ----
        wx0_ref[...] = (jnp.dot(x_ref[...], w0_ref[...],
                                preferred_element_type=jnp.float32)
                        + b0_ref[...])

        # ---- Loop-invariant values, hoisted out of the serial recurrence. ----
        U0 = u0_ref[...]                                   # (H0, 4*H0)
        WUs = [r[...] for r in wu_refs]                    # (2H, 4H) each
        biases = [jnp.broadcast_to(r[...], (Bp, r.shape[1])) for r in b_refs]

        # Activation-fusion lane vectors: one full-lane tanh per gate vector.
        # sigmoid(x) = 0.5*tanh(x/2) + 0.5 on the f/i/o blocks; candidate block
        # is a plain tanh with the test-mode drop_scale folded into post_mul.
        def gate_vectors(H, drop_scale):
            pre = jnp.concatenate([jnp.full((1, 3 * H), 0.5, jnp.float32),
                                   jnp.ones((1, H), jnp.float32)], axis=1)
            post_mul = jnp.concatenate([jnp.full((1, 3 * H), 0.5, jnp.float32),
                                        jnp.full((1, H), drop_scale, jnp.float32)],
                                       axis=1)
            post_add = jnp.concatenate([jnp.full((1, 3 * H), 0.5, jnp.float32),
                                        jnp.zeros((1, H), jnp.float32)], axis=1)
            return (jnp.broadcast_to(pre, (Bp, 4 * H)),
                    jnp.broadcast_to(post_mul, (Bp, 4 * H)),
                    jnp.broadcast_to(post_add, (Bp, 4 * H)))

        gvecs = [gate_vectors(hids[l], 1.0 - float(drops[l])) for l in range(n)]

        def gates(g, l):
            H = hids[l]
            pre, post_mul, post_add = gvecs[l]
            a = jnp.tanh(g * pre) * post_mul + post_add     # one EUP pass, 128 lanes
            return (a[:, 0:H], a[:, H:2 * H], a[:, 2 * H:3 * H], a[:, 3 * H:4 * H])

        def step(t, carry):
            off = t * Bp
            if not isinstance(off, int):
                off = pl.multiple_of(off, 8)
            new_carry = []

            # Layer 0: hoisted wx + single lane-dense recurrent matmul.
            h0, c0 = carry[0]
            g = wx0_ref[pl.ds(off, Bp), :] + jnp.dot(
                h0, U0, preferred_element_type=jnp.float32)
            ft, it, ot, cand = gates(g, 0)
            c_new = it * cand + ft * c0
            h_new = ot * jnp.tanh(c_new)
            new_carry.append((h_new, c_new))
            prev_h = h_new

            # Deeper layers, interleaved in the same time step:
            # one fused (W|U) matmul on concat([h_{l-1,t}, h_{l,t-1}]).
            for l in range(1, n):
                hl, cl = carry[l]
                inp = jnp.concatenate([prev_h, hl], axis=1)        # (Bp, 2H)
                g = jnp.dot(inp, WUs[l - 1],
                            preferred_element_type=jnp.float32) + biases[l - 1]
                ft, it, ot, cand = gates(g, l)
                c_new = it * cand + ft * cl
                h_new = ot * jnp.tanh(c_new)
                new_carry.append((h_new, c_new))
                prev_h = h_new

            out_ref[t] = prev_h.astype(out_ref.dtype)
            return tuple(new_carry)

        init = tuple((jnp.zeros((Bp, hids[l]), jnp.float32),
                      jnp.zeros((Bp, hids[l]), jnp.float32)) for l in range(n))
        lax.fori_loop(0, T, step, init, unroll=True)

    return kernel


# ------------------------------ full forward --------------------------------- #

@functools.partial(jax.jit, static_argnames=("lstm_drop",))
def qlstm_forward(x, params, lstm_drop):
    """QLSTM.forward for bidir=False, proj=False, test mode. x: [T, B, D] -> [T, B, H]."""
    T, B, D = x.shape
    n = len(params)

    # Pad batch to one full sublane tile (8) so all per-step accesses are aligned.
    Bp = max(8, ((B + 7) // 8) * 8)
    if Bp != B:
        x = jnp.pad(x, ((0, 0), (0, Bp - B), (0, 0)))
    x_flat = x.reshape(T * Bp, D)

    # Fuse the 4 gate weights/biases of every quaternion linear: [f | i | o | c].
    W_all = [jnp.concatenate([p["Wf"], p["Wi"], p["Wo"], p["Wc"]], axis=1) for p in params]
    U_all = [jnp.concatenate([p["Uf"], p["Ui"], p["Uo"], p["Uc"]], axis=1) for p in params]
    b_all = [jnp.concatenate([p["bf"], p["bi"], p["bo"], p["bc"]]).reshape(1, -1)
             for p in params]
    hids = [u.shape[0] for u in U_all]

    # Layers >= 1: fuse input + recurrent weights into one (H_{l-1}+H_l, 4*H_l)
    # matrix applied to concat([h_{l-1,t}, h_{l,t-1}]) inside the kernel.
    WU = [jnp.concatenate([W_all[l], U_all[l]], axis=0) for l in range(1, n)]

    kernel = make_fused_qlstm_kernel(n, T, Bp, hids, tuple(lstm_drop))

    inputs = [x_flat, W_all[0], b_all[0], U_all[0]] + WU + b_all[1:]
    scratch = [pltpu.VMEM((T * Bp, 4 * hids[0]), jnp.float32)]

    vmem = pl.BlockSpec(memory_space=pltpu.MemorySpace.VMEM)
    out = pl.pallas_call(
        kernel,
        out_shape=jax.ShapeDtypeStruct((T, Bp, hids[-1]), jnp.float32),
        in_specs=[vmem] * len(inputs),
        out_specs=vmem,
        scratch_shapes=scratch,
    )(*inputs)

    return out[:, :B, :]


# --------------------------- parameter construction ------------------------- #

def make_quaternion_weight(key, in_features, out_features):
    """Assemble the dense [in, out] weight of a QuaternionLinear layer from its
    r/i/j/k sub-blocks, exactly as quaternion_linear() does:
        [[ r -i -j -k]
         [ i  r -k  j]
         [ j  k  r -i]
         [ k -j  i  r]]  (block rows stacked along in, block cols along out)."""
    assert in_features % 4 == 0 and out_features % 4 == 0
    nin, nout = in_features // 4, out_features // 4
    kr, ki, kj, kk = jax.random.split(key, 4)
    # Deterministic glorot-style scale (synthetic init; not loading a checkpoint).
    s = (2.0 / (in_features + out_features)) ** 0.5
    r = s * jax.random.normal(kr, (nin, nout), jnp.float32)
    i = s * jax.random.normal(ki, (nin, nout), jnp.float32)
    j = s * jax.random.normal(kj, (nin, nout), jnp.float32)
    k = s * jax.random.normal(kk, (nin, nout), jnp.float32)
    col_r = jnp.concatenate([r, -i, -j, -k], axis=0)
    col_i = jnp.concatenate([i,  r, -k,  j], axis=0)
    col_j = jnp.concatenate([j,  k,  r, -i], axis=0)
    col_k = jnp.concatenate([k, -j,  i,  r], axis=0)
    return jnp.concatenate([col_r, col_i, col_j, col_k], axis=1)  # (in, out)


def make_qlstm_params(key, input_dim, lstm_lay):
    params = []
    cur = input_dim
    for li, H in enumerate(lstm_lay):
        keys = jax.random.split(jax.random.fold_in(key, li), 12)
        layer = dict(
            Wf=make_quaternion_weight(keys[0], cur, H),
            Wi=make_quaternion_weight(keys[1], cur, H),
            Wo=make_quaternion_weight(keys[2], cur, H),
            Wc=make_quaternion_weight(keys[3], cur, H),
            Uf=make_quaternion_weight(keys[4], H, H),
            Ui=make_quaternion_weight(keys[5], H, H),
            Uo=make_quaternion_weight(keys[6], H, H),
            Uc=make_quaternion_weight(keys[7], H, H),
            bf=0.1 * jax.random.normal(keys[8], (H,), jnp.float32),
            bi=0.1 * jax.random.normal(keys[9], (H,), jnp.float32),
            bo=0.1 * jax.random.normal(keys[10], (H,), jnp.float32),
            bc=0.1 * jax.random.normal(keys[11], (H,), jnp.float32),
        )
        params.append(layer)
        cur = H
    return params


# ------------------------------- reference ----------------------------------- #

def qlstm_layer_ref(x, p, drop):
    """Pure-JAX reference (lax.scan) for correctness checking."""
    T, B, D = x.shape
    H = p["Wf"].shape[1]
    drop_scale = 1.0 - drop

    def step(carry, xk):
        ht, ct = carry
        wfx = xk @ p["Wf"] + p["bf"]
        wix = xk @ p["Wi"] + p["bi"]
        wox = xk @ p["Wo"] + p["bo"]
        wcx = xk @ p["Wc"] + p["bc"]
        ft = jax.nn.sigmoid(wfx + ht @ p["Uf"])
        it = jax.nn.sigmoid(wix + ht @ p["Ui"])
        ot = jax.nn.sigmoid(wox + ht @ p["Uo"])
        ct_new = it * jnp.tanh(wcx + ht @ p["Uc"]) * drop_scale + ft * ct
        ht_new = ot * jnp.tanh(ct_new)
        return (ht_new, ct_new), ht_new

    init = (jnp.zeros((B, H), jnp.float32), jnp.zeros((B, H), jnp.float32))
    _, h = jax.lax.scan(step, init, x)
    return h


def qlstm_forward_ref(x, params, lstm_drop):
    for p, drop in zip(params, lstm_drop):
        x = qlstm_layer_ref(x, p, drop)
    return x


# ---------------------------------- main ------------------------------------ #

if __name__ == "__main__":
    # Module config (all dims divisible by 4, as quaternion layers require).
    T, B, input_dim = 8, 4, 16
    lstm_lay = [32, 32]
    lstm_drop = (0.0, 0.0)

    key = jax.random.PRNGKey(0)
    kx, kp = jax.random.split(key)
    x = jax.random.normal(kx, (T, B, input_dim), jnp.float32)   # [seq, batch, feat]
    params = make_qlstm_params(kp, input_dim, lstm_lay)

    out = jax.block_until_ready(qlstm_forward(x, params, lstm_drop))
    ref = jax.block_until_ready(qlstm_forward_ref(x, params, lstm_drop))

    assert out.shape == (T, B, lstm_lay[-1])
    assert jnp.allclose(out, ref, atol=1e-4, rtol=1e-4), "Pallas QLSTM mismatch vs reference"

    # TODO(synk): bidir=True path (flip + batch concat), proj_layer, and train-mode
    # Bernoulli dropout masks are config-off in this instantiation and not implemented.
    print("KERNEL_OK")
</pallas_src>

<mosaic_0001>
module attributes {stable_mosaic.version = 11 : i64} {
  func.func @kernel(%arg0: memref<64x16xf32, #tpu.memory_space<vmem>>, %arg1: memref<16x128xf32, #tpu.memory_space<vmem>>, %arg2: memref<1x128xf32, #tpu.memory_space<vmem>>, %arg3: memref<32x128xf32, #tpu.memory_space<vmem>>, %arg4: memref<64x128xf32, #tpu.memory_space<vmem>>, %arg5: memref<1x128xf32, #tpu.memory_space<vmem>>, %arg6: memref<8x8x32xf32, #tpu.memory_space<vmem>>, %arg7: memref<64x128xf32, #tpu.memory_space<vmem>>) attributes {dimension_semantics = [], scalar_prefetch = 0 : i64, scratch_operands = 1 : i64, tpu.core_type = #tpu.core_type<tc>} {
    %c0 = arith.constant 0 : index
    %c0_0 = arith.constant 0 : index
    %0 = vector.load %arg0[%c0, %c0_0] : memref<64x16xf32, #tpu.memory_space<vmem>>, vector<64x16xf32>
    %c0_1 = arith.constant 0 : index
    %c0_2 = arith.constant 0 : index
    %1 = vector.load %arg1[%c0_1, %c0_2] : memref<16x128xf32, #tpu.memory_space<vmem>>, vector<16x128xf32>
    %cst = arith.constant dense<0.000000e+00> : vector<64x128xf32>
    %2 = tpu.matmul %0, %1, %cst {dimension_numbers = #tpu.dot_dimension_numbers<[1], [0], [0], [1], [0, 0, 1, 1], [], []>} : vector<64x16xf32>, vector<16x128xf32>, vector<64x128xf32> -> vector<64x128xf32>
    %c0_3 = arith.constant 0 : index
    %c0_4 = arith.constant 0 : index
    %3 = vector.load %arg2[%c0_3, %c0_4] : memref<1x128xf32, #tpu.memory_space<vmem>>, vector<1x128xf32>
    %4 = vector.broadcast %3 : vector<1x128xf32> to vector<64x128xf32>
    %5 = arith.addf %2, %4 : vector<64x128xf32>
    %c0_5 = arith.constant 0 : index
    %c0_6 = arith.constant 0 : index
    %6 = vector.load %arg7[%c0_5, %c0_6] : memref<64x128xf32, #tpu.memory_space<vmem>>, vector<64x128xf32>
    tpu.vector_store %arg7[%c0_5, %c0_6], %5 {strides = array<i32>} : memref<64x128xf32, #tpu.memory_space<vmem>>, vector<64x128xf32>,
    %c0_7 = arith.constant 0 : index
    %c0_8 = arith.constant 0 : index
    %7 = vector.load %arg3[%c0_7, %c0_8] : memref<32x128xf32, #tpu.memory_space<vmem>>, vector<32x128xf32>
    %c0_9 = arith.constant 0 : index
    %c0_10 = arith.constant 0 : index
    %8 = vector.load %arg4[%c0_9, %c0_10] : memref<64x128xf32, #tpu.memory_space<vmem>>, vector<64x128xf32>
    %c0_11 = arith.constant 0 : index
    %c0_12 = arith.constant 0 : index
    %9 = vector.load %arg5[%c0_11, %c0_12] : memref<1x128xf32, #tpu.memory_space<vmem>>, vector<1x128xf32>
    %10 = vector.shape_cast %9 : vector<1x128xf32> to vector<1x128xf32>
    %11 = vector.broadcast %10 : vector<1x128xf32> to vector<8x128xf32>
    %cst_13 = arith.constant 5.000000e-01 : f32
    %12 = vector.broadcast %cst_13 : f32 to vector<1x96xf32>
    %cst_14 = arith.constant 1.000000e+00 : f32
    %13 = vector.broadcast %cst_14 : f32 to vector<1x32xf32>
    %14 = tpu.concatenate %12, %13 in 1 : vector<1x96xf32>, vector<1x32xf32> -> vector<1x128xf32>
    %cst_15 = arith.constant 5.000000e-01 : f32
    %15 = vector.broadcast %cst_15 : f32 to vector<1x96xf32>
    %cst_16 = arith.constant 1.000000e+00 : f32
    %16 = vector.broadcast %cst_16 : f32 to vector<1x32xf32>
    %17 = tpu.concatenate %15, %16 in 1 : vector<1x96xf32>, vector<1x32xf32> -> vector<1x128xf32>
    %cst_17 = arith.constant 5.000000e-01 : f32
    %18 = vector.broadcast %cst_17 : f32 to vector<1x96xf32>
    %cst_18 = arith.constant 0.000000e+00 : f32
    %19 = vector.broadcast %cst_18 : f32 to vector<1x32xf32>
    %20 = tpu.concatenate %18, %19 in 1 : vector<1x96xf32>, vector<1x32xf32> -> vector<1x128xf32>
    %21 = vector.shape_cast %14 : vector<1x128xf32> to vector<1x128xf32>
    %22 = vector.broadcast %21 : vector<1x128xf32> to vector<8x128xf32>
    %23 = vector.shape_cast %17 : vector<1x128xf32> to vector<1x128xf32>
    %24 = vector.broadcast %23 : vector<1x128xf32> to vector<8x128xf32>
    %25 = vector.shape_cast %20 : vector<1x128xf32> to vector<1x128xf32>
    %26 = vector.broadcast %25 : vector<1x128xf32> to vector<8x128xf32>
    %cst_19 = arith.constant 5.000000e-01 : f32
    %27 = vector.broadcast %cst_19 : f32 to vector<1x96xf32>
    %cst_20 = arith.constant 1.000000e+00 : f32
    %28 = vector.broadcast %cst_20 : f32 to vector<1x32xf32>
    %29 = tpu.concatenate %27, %28 in 1 : vector<1x96xf32>, vector<1x32xf32> -> vector<1x128xf32>
    %cst_21 = arith.constant 5.000000e-01 : f32
    %30 = vector.broadcast %cst_21 : f32 to vector<1x96xf32>
    %cst_22 = arith.constant 1.000000e+00 : f32
    %31 = vector.broadcast %cst_22 : f32 to vector<1x32xf32>
    %32 = tpu.concatenate %30, %31 in 1 : vector<1x96xf32>, vector<1x32xf32> -> vector<1x128xf32>
    %cst_23 = arith.constant 5.000000e-01 : f32
    %33 = vector.broadcast %cst_23 : f32 to vector<1x96xf32>
    %cst_24 = arith.constant 0.000000e+00 : f32
    %34 = vector.broadcast %cst_24 : f32 to vector<1x32xf32>
    %35 = tpu.concatenate %33, %34 in 1 : vector<1x96xf32>, vector<1x32xf32> -> vector<1x128xf32>
    %36 = vector.shape_cast %29 : vector<1x128xf32> to vector<1x128xf32>
    %37 = vector.broadcast %36 : vector<1x128xf32> to vector<8x128xf32>
    %38 = vector.shape_cast %32 : vector<1x128xf32> to vector<1x128xf32>
    %39 = vector.broadcast %38 : vector<1x128xf32> to vector<8x128xf32>
    %40 = vector.shape_cast %35 : vector<1x128xf32> to vector<1x128xf32>
    %41 = vector.broadcast %40 : vector<1x128xf32> to vector<8x128xf32>
    %cst_25 = arith.constant 0.000000e+00 : f32
    %42 = vector.broadcast %cst_25 : f32 to vector<8x32xf32>
    %cst_26 = arith.constant 0.000000e+00 : f32
    %43 = vector.broadcast %cst_26 : f32 to vector<8x32xf32>
    %cst_27 = arith.constant 0.000000e+00 : f32
    %44 = vector.broadcast %cst_27 : f32 to vector<8x32xf32>
    %cst_28 = arith.constant 0.000000e+00 : f32
    %45 = vector.broadcast %cst_28 : f32 to vector<8x32xf32>
    %c0_i32 = arith.constant 0 : i32
    %c8_i32 = arith.constant 8 : i32
    %46 = arith.muli %c0_i32, %c8_i32 : i32
    %47 = tpu.assume_multiple %46, 8 : i32
    %48 = arith.index_cast %47 : i32 to index
    %c0_29 = arith.constant 0 : index
    %49 = vector.load %arg7[%48, %c0_29] : memref<64x128xf32, #tpu.memory_space<vmem>>, vector<8x128xf32>
    %cst_30 = arith.constant dense<0.000000e+00> : vector<8x128xf32>
    %50 = tpu.matmul %42, %7, %cst_30 {dimension_numbers = #tpu.dot_dimension_numbers<[1], [0], [0], [1], [0, 0, 1, 1], [], []>} : vector<8x32xf32>, vector<32x128xf32>, vector<8x128xf32> -> vector<8x128xf32>
    %51 = arith.addf %49, %50 : vector<8x128xf32>
    %52 = arith.mulf %51, %22 : vector<8x128xf32>
    %53 = math.tanh %52 : vector<8x128xf32>
    %54 = arith.mulf %53, %24 : vector<8x128xf32>
    %55 = arith.addf %54, %26 : vector<8x128xf32>
    %56 = vector.extract_strided_slice %55 {offsets = [0, 0], sizes = [8, 32], strides = [1, 1]} : vector<8x128xf32> to vector<8x32xf32>
    %57 = vector.extract_strided_slice %55 {offsets = [0, 32], sizes = [8, 32], strides = [1, 1]} : vector<8x128xf32> to vector<8x32xf32>
    %58 = vector.extract_strided_slice %55 {offsets = [0, 64], sizes = [8, 32], strides = [1, 1]} : vector<8x128xf32> to vector<8x32xf32>
    %59 = vector.extract_strided_slice %55 {offsets = [0, 96], sizes = [8, 32], strides = [1, 1]} : vector<8x128xf32> to vector<8x32xf32>
    %60 = arith.mulf %57, %59 : vector<8x32xf32>
    %61 = arith.mulf %56, %43 : vector<8x32xf32>
    %62 = arith.addf %60, %61 : vector<8x32xf32>
    %63 = math.tanh %62 : vector<8x32xf32>
    %64 = arith.mulf %58, %63 : vector<8x32xf32>
    %65 = tpu.concatenate %64, %44 in 1 : vector<8x32xf32>, vector<8x32xf32> -> vector<8x64xf32>
    %cst_31 = arith.constant dense<0.000000e+00> : vector<8x128xf32>
    %66 = tpu.matmul %65, %8, %cst_31 {dimension_numbers = #tpu.dot_dimension_numbers<[1], [0], [0], [1], [0, 0, 1, 1], [], []>} : vector<8x64xf32>, vector<64x128xf32>, vector<8x128xf32> -> vector<8x128xf32>
    %67 = arith.addf %66, %11 : vector<8x128xf32>
    %68 = arith.mulf %67, %37 : vector<8x128xf32>
    %69 = math.tanh %68 : vector<8x128xf32>
    %70 = arith.mulf %69, %39 : vector<8x128xf32>
    %71 = arith.addf %70, %41 : vector<8x128xf32>
    %72 = vector.extract_strided_slice %71 {offsets = [0, 0], sizes = [8, 32], strides = [1, 1]} : vector<8x128xf32> to vector<8x32xf32>
    %73 = vector.extract_strided_slice %71 {offsets = [0, 32], sizes = [8, 32], strides = [1, 1]} : vector<8x128xf32> to vector<8x32xf32>
    %74 = vector.extract_strided_slice %71 {offsets = [0, 64], sizes = [8, 32], strides = [1, 1]} : vector<8x128xf32> to vector<8x32xf32>
    %75 = vector.extract_strided_slice %71 {offsets = [0, 96], sizes = [8, 32], strides = [1, 1]} : vector<8x128xf32> to vector<8x32xf32>
    %76 = arith.mulf %73, %75 : vector<8x32xf32>
    %77 = arith.mulf %72, %45 : vector<8x32xf32>
    %78 = arith.addf %76, %77 : vector<8x32xf32>
    %79 = math.tanh %78 : vector<8x32xf32>
    %80 = arith.mulf %74, %79 : vector<8x32xf32>
    %81 = arith.index_cast %c0_i32 : i32 to index
    %c0_32 = arith.constant 0 : index
    %c0_33 = arith.constant 0 : index
    %82 = vector.load %arg6[%81, %c0_32, %c0_33] : memref<8x8x32xf32, #tpu.memory_space<vmem>>, vector<1x8x32xf32>
    %83 = vector.shape_cast %82 : vector<1x8x32xf32> to vector<8x32xf32>
    %84 = vector.shape_cast %80 : vector<8x32xf32> to vector<1x8x32xf32>
    tpu.vector_store %arg6[%81, %c0_32, %c0_33], %84 {strides = array<i32>} : memref<8x8x32xf32, #tpu.memory_space<vmem>>, vector<1x8x32xf32>,
    %c1_i32 = arith.constant 1 : i32
    %c8_i32_34 = arith.constant 8 : i32
    %85 = arith.muli %c1_i32, %c8_i32_34 : i32
    %86 = tpu.assume_multiple %85, 8 : i32
    %87 = arith.index_cast %86 : i32 to index
    %c0_35 = arith.constant 0 : index
    %88 = vector.load %arg7[%87, %c0_35] : memref<64x128xf32, #tpu.memory_space<vmem>>, vector<8x128xf32>
    %cst_36 = arith.constant dense<0.000000e+00> : vector<8x128xf32>
    %89 = tpu.matmul %64, %7, %cst_36 {dimension_numbers = #tpu.dot_dimension_numbers<[1], [0], [0], [1], [0, 0, 1, 1], [], []>} : vector<8x32xf32>, vector<32x128xf32>, vector<8x128xf32> -> vector<8x128xf32>
    %90 = arith.addf %88, %89 : vector<8x128xf32>
    %91 = arith.mulf %90, %22 : vector<8x128xf32>
    %92 = math.tanh %91 : vector<8x128xf32>
    %93 = arith.mulf %92, %24 : vector<8x128xf32>
    %94 = arith.addf %93, %26 : vector<8x128xf32>
    %95 = vector.extract_strided_slice %94 {offsets = [0, 0], sizes = [8, 32], strides = [1, 1]} : vector<8x128xf32> to vector<8x32xf32>
    %96 = vector.extract_strided_slice %94 {offsets = [0, 32], sizes = [8, 32], strides = [1, 1]} : vector<8x128xf32> to vector<8x32xf32>
    %97 = vector.extract_strided_slice %94 {offsets = [0, 64], sizes = [8, 32], strides = [1, 1]} : vector<8x128xf32> to vector<8x32xf32>
    %98 = vector.extract_strided_slice %94 {offsets = [0, 96], sizes = [8, 32], strides = [1, 1]} : vector<8x128xf32> to vector<8x32xf32>
    %99 = arith.mulf %96, %98 : vector<8x32xf32>
    %100 = arith.mulf %95, %62 : vector<8x32xf32>
    %101 = arith.addf %99, %100 : vector<8x32xf32>
    %102 = math.tanh %101 : vector<8x32xf32>
    %103 = arith.mulf %97, %102 : vector<8x32xf32>
    %104 = tpu.concatenate %103, %80 in 1 : vector<8x32xf32>, vector<8x32xf32> -> vector<8x64xf32>
    %cst_37 = arith.constant dense<0.000000e+00> : vector<8x128xf32>
    %105 = tpu.matmul %104, %8, %cst_37 {dimension_numbers = #tpu.dot_dimension_numbers<[1], [0], [0], [1], [0, 0, 1, 1], [], []>} : vector<8x64xf32>, vector<64x128xf32>, vector<8x128xf32> -> vector<8x128xf32>
    %106 = arith.addf %105, %11 : vector<8x128xf32>
    %107 = arith.mulf %106, %37 : vector<8x128xf32>
    %108 = math.tanh %107 : vector<8x128xf32>
    %109 = arith.mulf %108, %39 : vector<8x128xf32>
    %110 = arith.addf %109, %41 : vector<8x128xf32>
    %111 = vector.extract_strided_slice %110 {offsets = [0, 0], sizes = [8, 32], strides = [1, 1]} : vector<8x128xf32> to vector<8x32xf32>
    %112 = vector.extract_strided_slice %110 {offsets = [0, 32], sizes = [8, 32], strides = [1, 1]} : vector<8x128xf32> to vector<8x32xf32>
    %113 = vector.extract_strided_slice %110 {offsets = [0, 64], sizes = [8, 32], strides = [1, 1]} : vector<8x128xf32> to vector<8x32xf32>
    %114 = vector.extract_strided_slice %110 {offsets = [0, 96], sizes = [8, 32], strides = [1, 1]} : vector<8x128xf32> to vector<8x32xf32>
    %115 = arith.mulf %112, %114 : vector<8x32xf32>
    %116 = arith.mulf %111, %78 : vector<8x32xf32>
    %117 = arith.addf %115, %116 : vector<8x32xf32>
    %118 = math.tanh %117 : vector<8x32xf32>
    %119 = arith.mulf %113, %118 : vector<8x32xf32>
    %120 = arith.index_cast %c1_i32 : i32 to index
    %c0_38 = arith.constant 0 : index
    %c0_39 = arith.constant 0 : index
    %121 = vector.load %arg6[%120, %c0_38, %c0_39] : memref<8x8x32xf32, #tpu.memory_space<vmem>>, vector<1x8x32xf32>
    %122 = vector.shape_cast %121 : vector<1x8x32xf32> to vector<8x32xf32>
    %123 = vector.shape_cast %119 : vector<8x32xf32> to vector<1x8x32xf32>
    tpu.vector_store %arg6[%120, %c0_38, %c0_39], %123 {strides = array<i32>} : memref<8x8x32xf32, #tpu.memory_space<vmem>>, vector<1x8x32xf32>,
    %c2_i32 = arith.constant 2 : i32
    %c8_i32_40 = arith.constant 8 : i32
    %124 = arith.muli %c2_i32, %c8_i32_40 : i32
    %125 = tpu.assume_multiple %124, 8 : i32
    %126 = arith.index_cast %125 : i32 to index
    %c0_41 = arith.constant 0 : index
    %127 = vector.load %arg7[%126, %c0_41] : memref<64x128xf32, #tpu.memory_space<vmem>>, vector<8x128xf32>
    %cst_42 = arith.constant dense<0.000000e+00> : vector<8x128xf32>
    %128 = tpu.matmul %103, %7, %cst_42 {dimension_numbers = #tpu.dot_dimension_numbers<[1], [0], [0], [1], [0, 0, 1, 1], [], []>} : vector<8x32xf32>, vector<32x128xf32>, vector<8x128xf32> -> vector<8x128xf32>
    %129 = arith.addf %127, %128 : vector<8x128xf32>
    %130 = arith.mulf %129, %22 : vector<8x128xf32>
    %131 = math.tanh %130 : vector<8x128xf32>
    %132 = arith.mulf %131, %24 : vector<8x128xf32>
    %133 = arith.addf %132, %26 : vector<8x128xf32>
    %134 = vector.extract_strided_slice %133 {offsets = [0, 0], sizes = [8, 32], strides = [1, 1]} : vector<8x128xf32> to vector<8x32xf32>
    %135 = vector.extract_strided_slice %133 {offsets = [0, 32], sizes = [8, 32], strides = [1, 1]} : vector<8x128xf32> to vector<8x32xf32>
    %136 = vector.extract_strided_slice %133 {offsets = [0, 64], sizes = [8, 32], strides = [1, 1]} : vector<8x128xf32> to vector<8x32xf32>
    %137 = vector.extract_strided_slice %133 {offsets = [0, 96], sizes = [8, 32], strides = [1, 1]} : vector<8x128xf32> to vector<8x32xf32>
    %138 = arith.mulf %135, %137 : vector<8x32xf32>
    %139 = arith.mulf %134, %101 : vector<8x32xf32>
    %140 = arith.addf %138, %139 : vector<8x32xf32>
    %141 = math.tanh %140 : vector<8x32xf32>
    %142 = arith.mulf %136, %141 : vector<8x32xf32>
    %143 = tpu.concatenate %142, %119 in 1 : vector<8x32xf32>, vector<8x32xf32> -> vector<8x64xf32>
    %cst_43 = arith.constant dense<0.000000e+00> : vector<8x128xf32>
    %144 = tpu.matmul %143, %8, %cst_43 {dimension_numbers = #tpu.dot_dimension_numbers<[1], [0], [0], [1], [0, 0, 1, 1], [], []>} : vector<8x64xf32>, vector<64x128xf32>, vector<8x128xf32> -> vector<8x128xf32>
    %145 = arith.addf %144, %11 : vector<8x128xf32>
    %146 = arith.mulf %145, %37 : vector<8x128xf32>
    %147 = math.tanh %146 : vector<8x128xf32>
    %148 = arith.mulf %147, %39 : vector<8x128xf32>
    %149 = arith.addf %148, %41 : vector<8x128xf32>
    %150 = vector.extract_strided_slice %149 {offsets = [0, 0], sizes = [8, 32], strides = [1, 1]} : vector<8x128xf32> to vector<8x32xf32>
    %151 = vector.extract_strided_slice %149 {offsets = [0, 32], sizes = [8, 32], strides = [1, 1]} : vector<8x128xf32> to vector<8x32xf32>
    %152 = vector.extract_strided_slice %149 {offsets = [0, 64], sizes = [8, 32], strides = [1, 1]} : vector<8x128xf32> to vector<8x32xf32>
    %153 = vector.extract_strided_slice %149 {offsets = [0, 96], sizes = [8, 32], strides = [1, 1]} : vector<8x128xf32> to vector<8x32xf32>
    %154 = arith.mulf %151, %153 : vector<8x32xf32>
    %155 = arith.mulf %150, %117 : vector<8x32xf32>
    %156 = arith.addf %154, %155 : vector<8x32xf32>
    %157 = math.tanh %156 : vector<8x32xf32>
    %158 = arith.mulf %152, %157 : vector<8x32xf32>
    %159 = arith.index_cast %c2_i32 : i32 to index
    %c0_44 = arith.constant 0 : index
    %c0_45 = arith.constant 0 : index
    %160 = vector.load %arg6[%159, %c0_44, %c0_45] : memref<8x8x32xf32, #tpu.memory_space<vmem>>, vector<1x8x32xf32>
    %161 = vector.shape_cast %160 : vector<1x8x32xf32> to vector<8x32xf32>
    %162 = vector.shape_cast %158 : vector<8x32xf32> to vector<1x8x32xf32>
    tpu.vector_store %arg6[%159, %c0_44, %c0_45], %162 {strides = array<i32>} : memref<8x8x32xf32, #tpu.memory_space<vmem>>, vector<1x8x32xf32>,
    %c3_i32 = arith.constant 3 : i32
    %c8_i32_46 = arith.constant 8 : i32
    %163 = arith.muli %c3_i32, %c8_i32_46 : i32
    %164 = tpu.assume_multiple %163, 8 : i32
    %165 = arith.index_cast %164 : i32 to index
    %c0_47 = arith.constant 0 : index
    %166 = vector.load %arg7[%165, %c0_47] : memref<64x128xf32, #tpu.memory_space<vmem>>, vector<8x128xf32>
    %cst_48 = arith.constant dense<0.000000e+00> : vector<8x128xf32>
    %167 = tpu.matmul %142, %7, %cst_48 {dimension_numbers = #tpu.dot_dimension_numbers<[1], [0], [0], [1], [0, 0, 1, 1], [], []>} : vector<8x32xf32>, vector<32x128xf32>, vector<8x128xf32> -> vector<8x128xf32>
    %168 = arith.addf %166, %167 : vector<8x128xf32>
    %169 = arith.mulf %168, %22 : vector<8x128xf32>
    %170 = math.tanh %169 : vector<8x128xf32>
    %171 = arith.mulf %170, %24 : vector<8x128xf32>
    %172 = arith.addf %171, %26 : vector<8x128xf32>
    %173 = vector.extract_strided_slice %172 {offsets = [0, 0], sizes = [8, 32], strides = [1, 1]} : vector<8x128xf32> to vector<8x32xf32>
    %174 = vector.extract_strided_slice %172 {offsets = [0, 32], sizes = [8, 32], strides = [1, 1]} : vector<8x128xf32> to vector<8x32xf32>
    %175 = vector.extract_strided_slice %172 {offsets = [0, 64], sizes = [8, 32], strides = [1, 1]} : vector<8x128xf32> to vector<8x32xf32>
    %176 = vector.extract_strided_slice %172 {offsets = [0, 96], sizes = [8, 32], strides = [1, 1]} : vector<8x128xf32> to vector<8x32xf32>
    %177 = arith.mulf %174, %176 : vector<8x32xf32>
    %178 = arith.mulf %173, %140 : vector<8x32xf32>
    %179 = arith.addf %177, %178 : vector<8x32xf32>
    %180 = math.tanh %179 : vector<8x32xf32>
    %181 = arith.mulf %175, %180 : vector<8x32xf32>
    %182 = tpu.concatenate %181, %158 in 1 : vector<8x32xf32>, vector<8x32xf32> -> vector<8x64xf32>
    %cst_49 = arith.constant dense<0.000000e+00> : vector<8x128xf32>
    %183 = tpu.matmul %182, %8, %cst_49 {dimension_numbers = #tpu.dot_dimension_numbers<[1], [0], [0], [1], [0, 0, 1, 1], [], []>} : vector<8x64xf32>, vector<64x128xf32>, vector<8x128xf32> -> vector<8x128xf32>
    %184 = arith.addf %183, %11 : vector<8x128xf32>
    %185 = arith.mulf %184, %37 : vector<8x128xf32>
    %186 = math.tanh %185 : vector<8x128xf32>
    %187 = arith.mulf %186, %39 : vector<8x128xf32>
    %188 = arith.addf %187, %41 : vector<8x128xf32>
    %189 = vector.extract_strided_slice %188 {offsets = [0, 0], sizes = [8, 32], strides = [1, 1]} : vector<8x128xf32> to vector<8x32xf32>
    %190 = vector.extract_strided_slice %188 {offsets = [0, 32], sizes = [8, 32], strides = [1, 1]} : vector<8x128xf32> to vector<8x32xf32>
    %191 = vector.extract_strided_slice %188 {offsets = [0, 64], sizes = [8, 32], strides = [1, 1]} : vector<8x128xf32> to vector<8x32xf32>
    %192 = vector.extract_strided_slice %188 {offsets = [0, 96], sizes = [8, 32], strides = [1, 1]} : vector<8x128xf32> to vector<8x32xf32>
    %193 = arith.mulf %190, %192 : vector<8x32xf32>
    %194 = arith.mulf %189, %156 : vector<8x32xf32>
    %195 = arith.addf %193, %194 : vector<8x32xf32>
    %196 = math.tanh %195 : vector<8x32xf32>
    %197 = arith.mulf %191, %196 : vector<8x32xf32>
    %198 = arith.index_cast %c3_i32 : i32 to index
    %c0_50 = arith.constant 0 : index
    %c0_51 = arith.constant 0 : index
    %199 = vector.load %arg6[%198, %c0_50, %c0_51] : memref<8x8x32xf32, #tpu.memory_space<vmem>>, vector<1x8x32xf32>
    %200 = vector.shape_cast %199 : vector<1x8x32xf32> to vector<8x32xf32>
    %201 = vector.shape_cast %197 : vector<8x32xf32> to vector<1x8x32xf32>
    tpu.vector_store %arg6[%198, %c0_50, %c0_51], %201 {strides = array<i32>} : memref<8x8x32xf32, #tpu.memory_space<vmem>>, vector<1x8x32xf32>,
    %c4_i32 = arith.constant 4 : i32
    %c8_i32_52 = arith.constant 8 : i32
    %202 = arith.muli %c4_i32, %c8_i32_52 : i32
    %203 = tpu.assume_multiple %202, 8 : i32
    %204 = arith.index_cast %203 : i32 to index
    %c0_53 = arith.constant 0 : index
    %205 = vector.load %arg7[%204, %c0_53] : memref<64x128xf32, #tpu.memory_space<vmem>>, vector<8x128xf32>
    %cst_54 = arith.constant dense<0.000000e+00> : vector<8x128xf32>
    %206 = tpu.matmul %181, %7, %cst_54 {dimension_numbers = #tpu.dot_dimension_numbers<[1], [0], [0], [1], [0, 0, 1, 1], [], []>} : vector<8x32xf32>, vector<32x128xf32>, vector<8x128xf32> -> vector<8x128xf32>
    %207 = arith.addf %205, %206 : vector<8x128xf32>
    %208 = arith.mulf %207, %22 : vector<8x128xf32>
    %209 = math.tanh %208 : vector<8x128xf32>
    %210 = arith.mulf %209, %24 : vector<8x128xf32>
    %211 = arith.addf %210, %26 : vector<8x128xf32>
    %212 = vector.extract_strided_slice %211 {offsets = [0, 0], sizes = [8, 32], strides = [1, 1]} : vector<8x128xf32> to vector<8x32xf32>
    %213 = vector.extract_strided_slice %211 {offsets = [0, 32], sizes = [8, 32], strides = [1, 1]} : vector<8x128xf32> to vector<8x32xf32>
    %214 = vector.extract_strided_slice %211 {offsets = [0, 64], sizes = [8, 32], strides = [1, 1]} : vector<8x128xf32> to vector<8x32xf32>
    %215 = vector.extract_strided_slice %211 {offsets = [0, 96], sizes = [8, 32], strides = [1, 1]} : vector<8x128xf32> to vector<8x32xf32>
    %216 = arith.mulf %213, %215 : vector<8x32xf32>
    %217 = arith.mulf %212, %179 : vector<8x32xf32>
    %218 = arith.addf %216, %217 : vector<8x32xf32>
    %219 = math.tanh %218 : vector<8x32xf32>
    %220 = arith.mulf %214, %219 : vector<8x32xf32>
    %221 = tpu.concatenate %220, %197 in 1 : vector<8x32xf32>, vector<8x32xf32> -> vector<8x64xf32>
    %cst_55 = arith.constant dense<0.000000e+00> : vector<8x128xf32>
    %222 = tpu.matmul %221, %8, %cst_55 {dimension_numbers = #tpu.dot_dimension_numbers<[1], [0], [0], [1], [0, 0, 1, 1], [], []>} : vector<8x64xf32>, vector<64x128xf32>, vector<8x128xf32> -> vector<8x128xf32>
    %223 = arith.addf %222, %11 : vector<8x128xf32>
    %224 = arith.mulf %223, %37 : vector<8x128xf32>
    %225 = math.tanh %224 : vector<8x128xf32>
    %226 = arith.mulf %225, %39 : vector<8x128xf32>
    %227 = arith.addf %226, %41 : vector<8x128xf32>
    %228 = vector.extract_strided_slice %227 {offsets = [0, 0], sizes = [8, 32], strides = [1, 1]} : vector<8x128xf32> to vector<8x32xf32>
    %229 = vector.extract_strided_slice %227 {offsets = [0, 32], sizes = [8, 32], strides = [1, 1]} : vector<8x128xf32> to vector<8x32xf32>
    %230 = vector.extract_strided_slice %227 {offsets = [0, 64], sizes = [8, 32], strides = [1, 1]} : vector<8x128xf32> to vector<8x32xf32>
    %231 = vector.extract_strided_slice %227 {offsets = [0, 96], sizes = [8, 32], strides = [1, 1]} : vector<8x128xf32> to vector<8x32xf32>
    %232 = arith.mulf %229, %231 : vector<8x32xf32>
    %233 = arith.mulf %228, %195 : vector<8x32xf32>
    %234 = arith.addf %232, %233 : vector<8x32xf32>
    %235 = math.tanh %234 : vector<8x32xf32>
    %236 = arith.mulf %230, %235 : vector<8x32xf32>
    %237 = arith.index_cast %c4_i32 : i32 to index
    %c0_56 = arith.constant 0 : index
    %c0_57 = arith.constant 0 : index
    %238 = vector.load %arg6[%237, %c0_56, %c0_57] : memref<8x8x32xf32, #tpu.memory_space<vmem>>, vector<1x8x32xf32>
    %239 = vector.shape_cast %238 : vector<1x8x32xf32> to vector<8x32xf32>
    %240 = vector.shape_cast %236 : vector<8x32xf32> to vector<1x8x32xf32>
    tpu.vector_store %arg6[%237, %c0_56, %c0_57], %240 {strides = array<i32>} : memref<8x8x32xf32, #tpu.memory_space<vmem>>, vector<1x8x32xf32>,
    %c5_i32 = arith.constant 5 : i32
    %c8_i32_58 = arith.constant 8 : i32
    %241 = arith.muli %c5_i32, %c8_i32_58 : i32
    %242 = tpu.assume_multiple %241, 8 : i32
    %243 = arith.index_cast %242 : i32 to index
    %c0_59 = arith.constant 0 : index
    %244 = vector.load %arg7[%243, %c0_59] : memref<64x128xf32, #tpu.memory_space<vmem>>, vector<8x128xf32>
    %cst_60 = arith.constant dense<0.000000e+00> : vector<8x128xf32>
    %245 = tpu.matmul %220, %7, %cst_60 {dimension_numbers = #tpu.dot_dimension_numbers<[1], [0], [0], [1], [0, 0, 1, 1], [], []>} : vector<8x32xf32>, vector<32x128xf32>, vector<8x128xf32> -> vector<8x128xf32>
    %246 = arith.addf %244, %245 : vector<8x128xf32>
    %247 = arith.mulf %246, %22 : vector<8x128xf32>
    %248 = math.tanh %247 : vector<8x128xf32>
    %249 = arith.mulf %248, %24 : vector<8x128xf32>
    %250 = arith.addf %249, %26 : vector<8x128xf32>
    %251 = vector.extract_strided_slice %250 {offsets = [0, 0], sizes = [8, 32], strides = [1, 1]} : vector<8x128xf32> to vector<8x32xf32>
    %252 = vector.extract_strided_slice %250 {offsets = [0, 32], sizes = [8, 32], strides = [1, 1]} : vector<8x128xf32> to vector<8x32xf32>
    %253 = vector.extract_strided_slice %250 {offsets = [0, 64], sizes = [8, 32], strides = [1, 1]} : vector<8x128xf32> to vector<8x32xf32>
    %254 = vector.extract_strided_slice %250 {offsets = [0, 96], sizes = [8, 32], strides = [1, 1]} : vector<8x128xf32> to vector<8x32xf32>
    %255 = arith.mulf %252, %254 : vector<8x32xf32>
    %256 = arith.mulf %251, %218 : vector<8x32xf32>
    %257 = arith.addf %255, %256 : vector<8x32xf32>
    %258 = math.tanh %257 : vector<8x32xf32>
    %259 = arith.mulf %253, %258 : vector<8x32xf32>
    %260 = tpu.concatenate %259, %236 in 1 : vector<8x32xf32>, vector<8x32xf32> -> vector<8x64xf32>
    %cst_61 = arith.constant dense<0.000000e+00> : vector<8x128xf32>
    %261 = tpu.matmul %260, %8, %cst_61 {dimension_numbers = #tpu.dot_dimension_numbers<[1], [0], [0], [1], [0, 0, 1, 1], [], []>} : vector<8x64xf32>, vector<64x128xf32>, vector<8x128xf32> -> vector<8x128xf32>
    %262 = arith.addf %261, %11 : vector<8x128xf32>
    %263 = arith.mulf %262, %37 : vector<8x128xf32>
    %264 = math.tanh %263 : vector<8x128xf32>
    %265 = arith.mulf %264, %39 : vector<8x128xf32>
    %266 = arith.addf %265, %41 : vector<8x128xf32>
    %267 = vector.extract_strided_slice %266 {offsets = [0, 0], sizes = [8, 32], strides = [1, 1]} : vector<8x128xf32> to vector<8x32xf32>
    %268 = vector.extract_strided_slice %266 {offsets = [0, 32], sizes = [8, 32], strides = [1, 1]} : vector<8x128xf32> to vector<8x32xf32>
    %269 = vector.extract_strided_slice %266 {offsets = [0, 64], sizes = [8, 32], strides = [1, 1]} : vector<8x128xf32> to vector<8x32xf32>
    %270 = vector.extract_strided_slice %266 {offsets = [0, 96], sizes = [8, 32], strides = [1, 1]} : vector<8x128xf32> to vector<8x32xf32>
    %271 = arith.mulf %268, %270 : vector<8x32xf32>
    %272 = arith.mulf %267, %234 : vector<8x32xf32>
    %273 = arith.addf %271, %272 : vector<8x32xf32>
    %274 = math.tanh %273 : vector<8x32xf32>
    %275 = arith.mulf %269, %274 : vector<8x32xf32>
    %276 = arith.index_cast %c5_i32 : i32 to index
    %c0_62 = arith.constant 0 : index
    %c0_63 = arith.constant 0 : index
    %277 = vector.load %arg6[%276, %c0_62, %c0_63] : memref<8x8x32xf32, #tpu.memory_space<vmem>>, vector<1x8x32xf32>
    %278 = vector.shape_cast %277 : vector<1x8x32xf32> to vector<8x32xf32>
    %279 = vector.shape_cast %275 : vector<8x32xf32> to vector<1x8x32xf32>
    tpu.vector_store %arg6[%276, %c0_62, %c0_63], %279 {strides = array<i32>} : memref<8x8x32xf32, #tpu.memory_space<vmem>>, vector<1x8x32xf32>,
    %c6_i32 = arith.constant 6 : i32
    %c8_i32_64 = arith.constant 8 : i32
    %280 = arith.muli %c6_i32, %c8_i32_64 : i32
    %281 = tpu.assume_multiple %280, 8 : i32
    %282 = arith.index_cast %281 : i32 to index
    %c0_65 = arith.constant 0 : index
    %283 = vector.load %arg7[%282, %c0_65] : memref<64x128xf32, #tpu.memory_space<vmem>>, vector<8x128xf32>
    %cst_66 = arith.constant dense<0.000000e+00> : vector<8x128xf32>
    %284 = tpu.matmul %259, %7, %cst_66 {dimension_numbers = #tpu.dot_dimension_numbers<[1], [0], [0], [1], [0, 0, 1, 1], [], []>} : vector<8x32xf32>, vector<32x128xf32>, vector<8x128xf32> -> vector<8x128xf32>
    %285 = arith.addf %283, %284 : vector<8x128xf32>
    %286 = arith.mulf %285, %22 : vector<8x128xf32>
    %287 = math.tanh %286 : vector<8x128xf32>
    %288 = arith.mulf %287, %24 : vector<8x128xf32>
    %289 = arith.addf %288, %26 : vector<8x128xf32>
    %290 = vector.extract_strided_slice %289 {offsets = [0, 0], sizes = [8, 32], strides = [1, 1]} : vector<8x128xf32> to vector<8x32xf32>
    %291 = vector.extract_strided_slice %289 {offsets = [0, 32], sizes = [8, 32], strides = [1, 1]} : vector<8x128xf32> to vector<8x32xf32>
    %292 = vector.extract_strided_slice %289 {offsets = [0, 64], sizes = [8, 32], strides = [1, 1]} : vector<8x128xf32> to vector<8x32xf32>
    %293 = vector.extract_strided_slice %289 {offsets = [0, 96], sizes = [8, 32], strides = [1, 1]} : vector<8x128xf32> to vector<8x32xf32>
    %294 = arith.mulf %291, %293 : vector<8x32xf32>
    %295 = arith.mulf %290, %257 : vector<8x32xf32>
    %296 = arith.addf %294, %295 : vector<8x32xf32>
    %297 = math.tanh %296 : vector<8x32xf32>
    %298 = arith.mulf %292, %297 : vector<8x32xf32>
    %299 = tpu.concatenate %298, %275 in 1 : vector<8x32xf32>, vector<8x32xf32> -> vector<8x64xf32>
    %cst_67 = arith.constant dense<0.000000e+00> : vector<8x128xf32>
    %300 = tpu.matmul %299, %8, %cst_67 {dimension_numbers = #tpu.dot_dimension_numbers<[1], [0], [0], [1], [0, 0, 1, 1], [], []>} : vector<8x64xf32>, vector<64x128xf32>, vector<8x128xf32> -> vector<8x128xf32>
    %301 = arith.addf %300, %11 : vector<8x128xf32>
    %302 = arith.mulf %301, %37 : vector<8x128xf32>
    %303 = math.tanh %302 : vector<8x128xf32>
    %304 = arith.mulf %303, %39 : vector<8x128xf32>
    %305 = arith.addf %304, %41 : vector<8x128xf32>
    %306 = vector.extract_strided_slice %305 {offsets = [0, 0], sizes = [8, 32], strides = [1, 1]} : vector<8x128xf32> to vector<8x32xf32>
    %307 = vector.extract_strided_slice %305 {offsets = [0, 32], sizes = [8, 32], strides = [1, 1]} : vector<8x128xf32> to vector<8x32xf32>
    %308 = vector.extract_strided_slice %305 {offsets = [0, 64], sizes = [8, 32], strides = [1, 1]} : vector<8x128xf32> to vector<8x32xf32>
    %309 = vector.extract_strided_slice %305 {offsets = [0, 96], sizes = [8, 32], strides = [1, 1]} : vector<8x128xf32> to vector<8x32xf32>
    %310 = arith.mulf %307, %309 : vector<8x32xf32>
    %311 = arith.mulf %306, %273 : vector<8x32xf32>
    %312 = arith.addf %310, %311 : vector<8x32xf32>
    %313 = math.tanh %312 : vector<8x32xf32>
    %314 = arith.mulf %308, %313 : vector<8x32xf32>
    %315 = arith.index_cast %c6_i32 : i32 to index
    %c0_68 = arith.constant 0 : index
    %c0_69 = arith.constant 0 : index
    %316 = vector.load %arg6[%315, %c0_68, %c0_69] : memref<8x8x32xf32, #tpu.memory_space<vmem>>, vector<1x8x32xf32>
    %317 = vector.shape_cast %316 : vector<1x8x32xf32> to vector<8x32xf32>
    %318 = vector.shape_cast %314 : vector<8x32xf32> to vector<1x8x32xf32>
    tpu.vector_store %arg6[%315, %c0_68, %c0_69], %318 {strides = array<i32>} : memref<8x8x32xf32, #tpu.memory_space<vmem>>, vector<1x8x32xf32>,
    %c7_i32 = arith.constant 7 : i32
    %c8_i32_70 = arith.constant 8 : i32
    %319 = arith.muli %c7_i32, %c8_i32_70 : i32
    %320 = tpu.assume_multiple %319, 8 : i32
    %321 = arith.index_cast %320 : i32 to index
    %c0_71 = arith.constant 0 : index
    %322 = vector.load %arg7[%321, %c0_71] : memref<64x128xf32, #tpu.memory_space<vmem>>, vector<8x128xf32>
    %cst_72 = arith.constant dense<0.000000e+00> : vector<8x128xf32>
    %323 = tpu.matmul %298, %7, %cst_72 {dimension_numbers = #tpu.dot_dimension_numbers<[1], [0], [0], [1], [0, 0, 1, 1], [], []>} : vector<8x32xf32>, vector<32x128xf32>, vector<8x128xf32> -> vector<8x128xf32>
    %324 = arith.addf %322, %323 : vector<8x128xf32>
    %325 = arith.mulf %324, %22 : vector<8x128xf32>
    %326 = math.tanh %325 : vector<8x128xf32>
    %327 = arith.mulf %326, %24 : vector<8x128xf32>
    %328 = arith.addf %327, %26 : vector<8x128xf32>
    %329 = vector.extract_strided_slice %328 {offsets = [0, 0], sizes = [8, 32], strides = [1, 1]} : vector<8x128xf32> to vector<8x32xf32>
    %330 = vector.extract_strided_slice %328 {offsets = [0, 32], sizes = [8, 32], strides = [1, 1]} : vector<8x128xf32> to vector<8x32xf32>
    %331 = vector.extract_strided_slice %328 {offsets = [0, 64], sizes = [8, 32], strides = [1, 1]} : vector<8x128xf32> to vector<8x32xf32>
    %332 = vector.extract_strided_slice %328 {offsets = [0, 96], sizes = [8, 32], strides = [1, 1]} : vector<8x128xf32> to vector<8x32xf32>
    %333 = arith.mulf %330, %332 : vector<8x32xf32>
    %334 = arith.mulf %329, %296 : vector<8x32xf32>
    %335 = arith.addf %333, %334 : vector<8x32xf32>
    %336 = math.tanh %335 : vector<8x32xf32>
    %337 = arith.mulf %331, %336 : vector<8x32xf32>
    %338 = tpu.concatenate %337, %314 in 1 : vector<8x32xf32>, vector<8x32xf32> -> vector<8x64xf32>
    %cst_73 = arith.constant dense<0.000000e+00> : vector<8x128xf32>
    %339 = tpu.matmul %338, %8, %cst_73 {dimension_numbers = #tpu.dot_dimension_numbers<[1], [0], [0], [1], [0, 0, 1, 1], [], []>} : vector<8x64xf32>, vector<64x128xf32>, vector<8x128xf32> -> vector<8x128xf32>
    %340 = arith.addf %339, %11 : vector<8x128xf32>
    %341 = arith.mulf %340, %37 : vector<8x128xf32>
    %342 = math.tanh %341 : vector<8x128xf32>
    %343 = arith.mulf %342, %39 : vector<8x128xf32>
    %344 = arith.addf %343, %41 : vector<8x128xf32>
    %345 = vector.extract_strided_slice %344 {offsets = [0, 0], sizes = [8, 32], strides = [1, 1]} : vector<8x128xf32> to vector<8x32xf32>
    %346 = vector.extract_strided_slice %344 {offsets = [0, 32], sizes = [8, 32], strides = [1, 1]} : vector<8x128xf32> to vector<8x32xf32>
    %347 = vector.extract_strided_slice %344 {offsets = [0, 64], sizes = [8, 32], strides = [1, 1]} : vector<8x128xf32> to vector<8x32xf32>
    %348 = vector.extract_strided_slice %344 {offsets = [0, 96], sizes = [8, 32], strides = [1, 1]} : vector<8x128xf32> to vector<8x32xf32>
    %349 = arith.mulf %346, %348 : vector<8x32xf32>
    %350 = arith.mulf %345, %312 : vector<8x32xf32>
    %351 = arith.addf %349, %350 : vector<8x32xf32>
    %352 = math.tanh %351 : vector<8x32xf32>
    %353 = arith.mulf %347, %352 : vector<8x32xf32>
    %354 = arith.index_cast %c7_i32 : i32 to index
    %c0_74 = arith.constant 0 : index
    %c0_75 = arith.constant 0 : index
    %355 = vector.load %arg6[%354, %c0_74, %c0_75] : memref<8x8x32xf32, #tpu.memory_space<vmem>>, vector<1x8x32xf32>
    %356 = vector.shape_cast %355 : vector<1x8x32xf32> to vector<8x32xf32>
    %357 = vector.shape_cast %353 : vector<8x32xf32> to vector<1x8x32xf32>
    tpu.vector_store %arg6[%354, %c0_74, %c0_75], %357 {strides = array<i32>} : memref<8x8x32xf32, #tpu.memory_space<vmem>>, vector<1x8x32xf32>,
    %c8_i32_76 = arith.constant 8 : i32
    return
  }
}

</mosaic_0001>

<bundles_post_ra>
// kernel: qlstm_forward.1
= control target key start
LH: loop header
LB: loop body
LE: loop exit
PB: predicated region body
PF: predicated region fallthrough
CT: control target
= control target key end

     0   :  { %vm40_vm0 = vcmask 130048   ;;  %v2527_v0 = vmov 0.0|0.0   ;;  %vm2528_vm1 = vmmov 0   ;;  %v2529_v4 = vmov 0.0   ;;  %s2532_s13 = smov 32   ;;  %s2533_s14 = smov 96   ;;  %s3048_s1 = inlined_call_operand.vmem [shape: f32[16,128], index: 1, kind: input, shape index: {}]   ;;  %s3049_s3 = inlined_call_operand.vmem [shape: f32[32,128], index: 3, kind: input, shape index: {}]   ;;  %s3050_s0 = inlined_call_operand.vmem [shape: f32[64,16], index: 0, kind: input, shape index: {}]   ;;  %s3051_s2 = inlined_call_operand.vmem [shape: f32[1,128], index: 2, kind: input, shape index: {}]   ;;  %s3052_s4 = inlined_call_operand.vmem [shape: f32[64,128], index: 4, kind: input, shape index: {}]   ;;  %s3053_s5 = inlined_call_operand.vmem [shape: f32[1,128], index: 5, kind: input, shape index: {}]   ;;  %s3054_s6 = inlined_call_operand.vmem [shape: f32[8,8,32], index: 6, kind: output, shape index: {}]  }
   0x1   :  { %2312 = vmatprep.subr.bf16.mxu1 %v2527_v0  ;;  %v31_v1 = vld [vmem:[%s3048_s1] sm:$0xff]  ;;  %v32_v2 = vld [vmem:[%s3048_s1 + $0x8] sm:$0xff]  ;;  %2076 = vmatprep.mubr.msk.f32.mxu1 %vm2528_vm1, %v2529_v4  ;;  %v180_v9 = vld [vmem:[%s3049_s3 + $0x10] sm:$0xff]  ;;  %v200_v13 = vlaneseq  ;;  %vm197_vm2 = vcmask 785408   ;;  %v2530_v18 = vmov 1.0   ;;  %vm209_vm3 = vcmask 261120  }
   0x2   :  { %v178_v3 = vld [vmem:[%s3049_s3] sm:$0xff]  ;;  %v2308_v5 = vpack.c.bf16 %v32_v2, %v31_v1  ;;  %v179_v6 = vld [vmem:[%s3049_s3 + $0x8] sm:$0xff]  ;;  %v181_v10 = vld [vmem:[%s3049_s3 + $0x18] sm:$0xff]  ;;  %v198_v19 = vsel %vm197_vm2, 0.5, %v2530_v18  ;;  %v199_v27 = vsel %vm197_vm2, 0.5, %v2529_v4  ;;  %vm310_vm4 = vcmask 523264  }
   0x3   :  { %v23_v7 = vld [vmem:[%s3050_s0] sm:$0xff]  ;;  %v2587_v8 = vpack.c.bf16 %v179_v6, %v178_v3  ;;  %v24_v11 = vld [vmem:[%s3050_s0 + $0x8] sm:$0xff]  ;;  %v2600_v12 = vpack.c.bf16 %v181_v10, %v180_v9  ;;  %v201_v14 = vshrl.u32 %v200_v13, 7  ;;  %v25_v37 = vld [vmem:[%s3050_s0 + $0x10] sm:$0xff] }
   0x4   :  { %2056 = vmatprep.mubr.msk.f32.mxu0 %vm40_vm0, %v23_v7  ;;  %2309 = vmatprep.subr.bf16.mxu0 %v2308_v5  ;;  %v2613_v15 = vld [vmem:[%s3051_s2] ss:$0 sm:$0xff]  ;;  %s2531_s2 = smov 64   ;;  %v26_v38 = vld [vmem:[%s3050_s0 + $0x18] sm:$0xff]  ;;  %v183_v41 = vld [vmem:[%s3052_s4 + $0x8] sm:$0xff] }
   0x5   :  { %2314 = vmatpush3.bf16.msra.mxu1 %v2587_v8  ;;  %2311 = vmatpush3.bf16.msra.mxu0 %v2308_v5  ;;  %v202_v16 = vsub.s32 0, %v201_v14  ;;  %v27_v39 = vld [vmem:[%s3050_s0 + $0x20] sm:$0xff]  ;;  %v184_v42 = vld [vmem:[%s3052_s4 + $0x10] sm:$0xff]  ;;  %v185_v44 = vld [vmem:[%s3052_s4 + $0x18] sm:$0xff] }
   0x6   :  { %2315 = vmatprep.subr.bf16.mxu1 %v2527_v0  ;;  %2318 = vmatprep.subr.bf16.mxu0 %v2527_v0  ;;  %v182_v40 = vld [vmem:[%s3052_s4] sm:$0xff]  ;;  %v28_v45 = vld [vmem:[%s3050_s0 + $0x28] sm:$0xff]  ;;  %v2659_v46 = vpack.c.bf16 %v185_v44, %v184_v42  ;;  %v29_v47 = vld [vmem:[%s3050_s0 + $0x30] sm:$0xff] }
   0x7   :  { %v2618_v22 = vrot.slane %v198_v19, %v202_v16  ;;  %v2622_v28 = vrot.slane %v199_v27, %v202_v16  ;;  %v2648_v43 = vpack.c.bf16 %v183_v41, %v182_v40  ;;  %v186_v48 = vld [vmem:[%s3052_s4 + $0x20] sm:$0xff]  ;;  %v187_v49 = vld [vmem:[%s3052_s4 + $0x28] sm:$0xff]  ;;  %v30_v50 = vld [vmem:[%s3050_s0 + $0x38] sm:$0xff] }
   0x8   :  { %2057 = vmatmul.mubr.msk.f32.vlgmr.msra.gmra.mrb[0].mxu0 %vm40_vm0, %v24_v11  ;;  %v2679_v51 = vpack.c.bf16 %v187_v49, %v186_v48  ;;  %v188_v52 = vld [vmem:[%s3052_s4 + $0x30] sm:$0xff]  ;;  %v189_v53 = vld [vmem:[%s3052_s4 + $0x38] sm:$0xff]  ;;  %v2735_v3 = vld [vmem:[%s3053_s5] ss:$0 sm:$0xff] }
   0x9   :  { %2317 = vmatpush3.bf16.msra.mxu1 %v2600_v12  ;;  %2059 = vmatprep.mubr.msk.f32.mxu0 %vm40_vm0, %v25_v37  ;;  %v2695_v55 = vpack.c.bf16 %v189_v53, %v188_v52 }
   0xa   :  { %2336 = vmatprep.subr.bf16.mxu1 %v2527_v0  ;;  %2320 = vmatpush3.bf16.msra.mxu0 %v2648_v43 }
   0xb   :  { %2321 = vmatprep.subr.bf16.mxu0 %v2527_v0 }
   0xc   :  { %2077 = vmatmul.mubr.f32.vlgmr.msra.gmra.mrb[0].mxu1 %v2529_v4  ;;  %2060 = vmatmul.mubr.msk.f32.gmra.mrb[2].mxu0 %vm40_vm0, %v26_v38 }
   0xd   :  { %2125 = vmatprep.mubr.msk.f32.mxu1 %vm2528_vm1, %v2529_v4  ;;  %2062 = vmatprep.mubr.msk.f32.mxu0 %vm40_vm0, %v27_v39 }
   0xe   :  { %2338 = vmatpush3.bf16.msra.mxu1 %v2648_v43  ;;  %2323 = vmatpush3.bf16.msra.mxu0 %v2659_v46 }
   0xf   :  { %2339 = vmatprep.subr.bf16.mxu1 %v2527_v0  ;;  %2324 = vmatprep.subr.bf16.mxu0 %v2527_v0 }
  0x10   :  { %2063 = vmatmul.mubr.msk.f32.gmra.mrb[4].mxu0 %vm40_vm0, %v28_v45 }
  0x11   :  { %2065 = vmatprep.mubr.msk.f32.mxu0 %vm40_vm0, %v29_v47 }
  0x12   :  { %2341 = vmatpush3.bf16.msra.mxu1 %v2659_v46  ;;  %2326 = vmatpush3.bf16.msra.mxu0 %v2679_v51 }
  0x13   :  { %2342 = vmatprep.subr.bf16.mxu1 %v2527_v0  ;;  %2327 = vmatprep.subr.bf16.mxu0 %v2527_v0 }
  0x14   :  { %2066 = vmatmul.mubr.msk.f32.gmra.mrb[6].mxu0 %vm40_vm0, %v30_v50 }
  0x15   :  { %2095 = vmatprep.mubr.msk.f32.mxu0 %vm2528_vm1, %v2529_v4 }
  0x16   :  { %2344 = vmatpush3.bf16.msra.mxu1 %v2679_v51  ;;  %2329 = vmatpush3.bf16.msra.mxu0 %v2695_v55 }
  0x17   :  { %2345 = vmatprep.subr.bf16.mxu1 %v2527_v0  ;;  %2330 = vmatprep.subr.bf16.mxu0 %v2527_v0 }
  0x1a   :  { %2347 = vmatpush3.bf16.msra.mxu1 %v2695_v55 }
  0x1b   :  { %2366 = vmatprep.subr.bf16.mxu1 %v2527_v0 }
  0xdb   :  { %v2615_v17 = vpop.f32.mrb[0].mxu0 }
  0xdc   :  { %v131_v20 = vpop.f32.mrb[1].mxu0  ;;  %v137_v10 = vadd.f32 %v2615_v17, %v2613_v15 }
  0xdd   :  { %v132_v21 = vadd.f32 %v2613_v15, %v131_v20 }
  0xdf   :  { %v279_v23 = vpop.f32.mrb[0].mxu1  ;;  %v2705_v58 = vpop.f32.mrb[2].mxu0 }
  0xe0   :  { %v283_v24 = vadd.f32 %v279_v23, %v132_v21  ;;  %v2078_v25 = vpop.f32.mrb[1].mxu1  ;;  %v2707_v59 = vpop.f32.mrb[3].mxu0 }
  0xe1   :  { %v142_v47 = vadd.f32 %v2613_v15, %v2707_v59 }
  0xe2   :  { %v284_v26 = vmul.f32 %v283_v24, %v2618_v22 }
  0xe3   :  { %v2709_v60 = vpop.f32.mrb[4].mxu0 }
  0xe4   :  { %2463 = vtanh.f32 %v284_v26  ;;  %v2711_v61 = vpop.f32.mrb[5].mxu0 }
  0xe7   :  { %v2713_v62 = vpop.f32.mrb[6].mxu0 }
  0xe8   :  { %v2715_v63 = vpop.f32.mrb[7].mxu0 }
  0xee   :  { %v2464_v29 = vpop.eup %2463 }
  0xef   :  { %v286_v30 = vmul.f32 %v2464_v29, %v2618_v22 }
  0xf1   :  { %v287_v31 = vadd.f32 %v286_v30, %v2622_v28 }
  0xf3   :  { %289 = vrot.lane.b32.xlu0 %v287_v31, %s2531_s2  ;;  %v293_v32 = vmul.f32 0.0, %v287_v31 }
  0xf7   :  { %295 = vrot.lane.b32.xlu0 %v293_v32, %s2532_s13 }
 0x165   :  { %v290_v33 = vpop.permute.xlu0 %289 }
 0x166   :  { %v292_v34 = vmul.f32 %v290_v33, %v287_v31 }
 0x169   :  { %v296_v35 = vpop.permute.xlu0 %295 }
 0x16a   :  { %v298_v36 = vadd.f32 %v296_v35, %v292_v34 }
 0x16c   :  { %2465 = vtanh.f32 %v298_v36  ;;  %495 = vrot.lane.b32.xlu0 %v298_v36, %s2533_s14 }
 0x176   :  { %v2466_v54 = vpop.eup %2465 }
 0x177   :  { %301 = vrot.lane.b32.xlu1 %v2466_v54, %s2532_s13 }
 0x1de   :  { %v496_v25 = vpop.permute.xlu0 %495 }
 0x1e9   :  { %v302_v56 = vpop.permute.xlu1 %301 }
 0x1ea   :  { %v304_v57 = vmul.f32 %v302_v56, %v287_v31 }
 0x1ec   :  { %306 = vrot.lane.b32.xlu1 %v304_v57, %s2531_s2 }
 0x25e   :  { %v307_v1 = vpop.permute.xlu1 %306 }
 0x25f   :  { %v309_v2 = vsel %vm209_vm3, %v307_v1, 0.0 }
 0x260   :  { %2096 = vmatmul.mubr.msk.f32.vlgmr.msra.gmra.mrb[8].mxu0 %vm310_vm4, %v309_v2 }
 0x261   :  { %2332 = vmatpush3.bf16.msra.mxu0 %v2587_v8  ;;  %2106 = vmatprep.mubr.msk.f32.mxu0 %vm2528_vm1, %v2529_v4 }
 0x262   :  { %2333 = vmatprep.subr.bf16.mxu0 %v2527_v0 }
 0x265   :  { %2335 = vmatpush3.bf16.msra.mxu0 %v2600_v12 }
 0x266   :  { %2348 = vmatprep.subr.bf16.mxu0 %v2527_v0 }
 0x268   :  { %2107 = vmatmul.mubr.msk.f32.vlgmr.msra.gmra.mrb[10].mxu0 %vm209_vm3, %v307_v1 }
 0x269   :  { %2350 = vmatpush3.bf16.msra.mxu0 %v2587_v8  ;;  %2136 = vmatprep.mubr.msk.f32.mxu0 %vm2528_vm1, %v2529_v4 }
 0x26a   :  { %2351 = vmatprep.subr.bf16.mxu0 %v2527_v0 }
 0x26d   :  { %2353 = vmatpush3.bf16.msra.mxu0 %v2600_v12 }
 0x26e   :  { %2354 = vmatprep.subr.bf16.mxu0 %v2527_v0 }
 0x333   :  { %v380_v5 = vpop.f32.mrb[8].mxu0 }
 0x334   :  { %v381_v6 = vadd.f32 %v2735_v3, %v380_v5  ;;  %v2097_v7 = vpop.f32.mrb[9].mxu0 }
 0x336   :  { %v384_v9 = vmul.f32 %v381_v6, %v2618_v22 }
 0x338   :  { %2467 = vtanh.f32 %v384_v9 }
 0x33b   :  { %v480_v11 = vpop.f32.mrb[10].mxu0 }
 0x33c   :  { %v484_v13 = vadd.f32 %v480_v11, %v137_v10  ;;  %v2108_v14 = vpop.f32.mrb[11].mxu0 }
 0x33e   :  { %v485_v16 = vmul.f32 %v484_v13, %v2618_v22 }
 0x340   :  { %2469 = vtanh.f32 %v485_v16 }
 0x342   :  { %v2468_v18 = vpop.eup %2467 }
 0x343   :  { %v386_v19 = vmul.f32 %v2468_v18, %v2618_v22 }
 0x345   :  { %v387_v20 = vadd.f32 %v386_v19, %v2622_v28 }
 0x347   :  { %389 = vrot.lane.b32.xlu1 %v387_v20, %s2531_s2  ;;  %v393_v21 = vmul.f32 0.0, %v387_v20 }
 0x34a   :  { %v2470_v23 = vpop.eup %2469 }
 0x34b   :  { %395 = vrot.lane.b32.xlu1 %v393_v21, %s2532_s13  ;;  %v487_v24 = vmul.f32 %v2470_v23, %v2618_v22 }
 0x34d   :  { %v488_v17 = vadd.f32 %v487_v24, %v2622_v28 }
 0x34f   :  { %490 = vrot.lane.b32.xlu0 %v488_v17, %s2531_s2  ;;  %v498_v26 = vmul.f32 %v496_v25, %v488_v17 }
 0x353   :  { %500 = vrot.lane.b32.xlu0 %v498_v26, %s2532_s13 }
 0x3b9   :  { %v390_v27 = vpop.permute.xlu1 %389 }
 0x3ba   :  { %v392_v29 = vmul.f32 %v390_v27, %v387_v20 }
 0x3bd   :  { %v396_v30 = vpop.permute.xlu1 %395 }
 0x3be   :  { %v398_v31 = vadd.f32 %v396_v30, %v392_v29 }
 0x3c0   :  { %2471 = vtanh.f32 %v398_v31 }
 0x3c1   :  { %v491_v32 = vpop.permute.xlu0 %490 }
 0x3c2   :  { %v493_v33 = vmul.f32 %v491_v32, %v488_v17 }
 0x3c5   :  { %v501_v34 = vpop.permute.xlu0 %500 }
 0x3c6   :  { %v503_v35 = vadd.f32 %v501_v34, %v493_v33  ;;  %v147_v34 = vadd.f32 %v2705_v58, %v2613_v15 }
 0x3c8   :  { %2473 = vtanh.f32 %v503_v35 }
 0x3ca   :  { %v2472_v36 = vpop.eup %2471 }
 0x3cb   :  { %401 = vrot.lane.b32.xlu1 %v2472_v36, %s2532_s13 }
 0x3d2   :  { %v2474_v37 = vpop.eup %2473 }
 0x3d3   :  { %506 = vrot.lane.b32.xlu0 %v2474_v37, %s2532_s13 }
 0x43d   :  { %v402_v38 = vpop.permute.xlu1 %401 }
 0x43e   :  { %v2752_v39 = vmul.f32 %v402_v38, %v387_v20 }
 0x440   :  { %514 = vrot.lane.b32.xlu0 %v2752_v39, %s2533_s14 }
 0x444   :  { %707 = vrot.lane.b32.xlu0 %v503_v35, %s2533_s14 }
 0x445   :  { %v507_v40 = vpop.permute.xlu0 %506 }
 0x446   :  { %v509_v41 = vmul.f32 %v507_v40, %v488_v17 }
 0x448   :  { %511 = vrot.lane.b32.xlu1 %v509_v41, %s2531_s2 }
 0x44c   :  { %601 = vrot.lane.b32.xlu1 %v398_v31, %s2533_s14 }
 0x4b2   :  { %v515_v42 = vpop.permute.xlu0 %514 }
 0x4b6   :  { %v708_v9 = vpop.permute.xlu0 %707 }
 0x4ba   :  { %v512_v44 = vpop.permute.xlu1 %511 }
 0x4bb   :  { %v517_v45 = vsel %vm209_vm3, %v512_v44, %v515_v42  ;;  %2137 = vmatmul.mubr.msk.f32.vlgmr.msra.gmra.mrb[12].mxu0 %vm209_vm3, %v512_v44 }
 0x4bc   :  { %2126 = vmatmul.mubr.msk.f32.vlgmr.msra.gmra.mrb[2].mxu1 %vm310_vm4, %v517_v45  ;;  %2356 = vmatpush3.bf16.msra.mxu0 %v2648_v43 }
 0x4bd   :  { %2357 = vmatprep.subr.bf16.mxu0 %v2527_v0  ;;  %2368 = vmatpush3.bf16.msra.mxu1 %v2587_v8 }
 0x4be   :  { %2369 = vmatprep.subr.bf16.mxu1 %v2527_v0  ;;  %2166 = vmatprep.mubr.msk.f32.mxu1 %vm2528_vm1, %v2529_v4  ;;  %v602_v10 = vpop.permute.xlu1 %601 }
 0x4bf   :  { %2155 = vmatprep.mubr.msk.f32.mxu0 %vm2528_vm1, %v2529_v4 }
 0x4c0   :  { %2359 = vmatpush3.bf16.msra.mxu0 %v2659_v46 }
 0x4c1   :  { %2360 = vmatprep.subr.bf16.mxu0 %v2527_v0  ;;  %2371 = vmatpush3.bf16.msra.mxu1 %v2600_v12 }
 0x4c2   :  { %2372 = vmatprep.subr.bf16.mxu1 %v2527_v0 }
 0x4c4   :  { %2362 = vmatpush3.bf16.msra.mxu0 %v2679_v51 }
 0x4c5   :  { %2363 = vmatprep.subr.bf16.mxu0 %v2527_v0 }
 0x4c8   :  { %2365 = vmatpush3.bf16.msra.mxu0 %v2695_v55 }
 0x4c9   :  { %2384 = vmatprep.subr.bf16.mxu0 %v2527_v0 }
 0x58e   :  { %v692_v48 = vpop.f32.mrb[12].mxu0 }
 0x58f   :  { %v696_v49 = vadd.f32 %v692_v48, %v142_v47  ;;  %v587_v50 = vpop.f32.mrb[2].mxu1  ;;  %v2138_v52 = vpop.f32.mrb[13].mxu0 }
 0x590   :  { %v588_v53 = vadd.f32 %v2735_v3, %v587_v50  ;;  %v2127_v54 = vpop.f32.mrb[3].mxu1 }
 0x591   :  { %v697_v56 = vmul.f32 %v696_v49, %v2618_v22 }
 0x592   :  { %v591_v57 = vmul.f32 %v588_v53, %v2618_v22 }
 0x593   :  { %2475 = vtanh.f32 %v697_v56 }
 0x594   :  { %2477 = vtanh.f32 %v591_v57 }
 0x59d   :  { %v2476_v1 = vpop.eup %2475 }
 0x59e   :  { %v2478_v2 = vpop.eup %2477  ;;  %v699_v5 = vmul.f32 %v2476_v1, %v2618_v22 }
 0x59f   :  { %v593_v6 = vmul.f32 %v2478_v2, %v2618_v22 }
 0x5a0   :  { %v700_v59 = vadd.f32 %v699_v5, %v2622_v28 }
 0x5a1   :  { %v594_v7 = vadd.f32 %v593_v6, %v2622_v28 }
 0x5a2   :  { %702 = vrot.lane.b32.xlu0 %v700_v59, %s2531_s2  ;;  %v710_v11 = vmul.f32 %v708_v9, %v700_v59 }
 0x5a3   :  { %596 = vrot.lane.b32.xlu1 %v594_v7, %s2531_s2  ;;  %v604_v13 = vmul.f32 %v602_v10, %v594_v7 }
 0x5a6   :  { %712 = vrot.lane.b32.xlu0 %v710_v11, %s2532_s13 }
 0x5a7   :  { %606 = vrot.lane.b32.xlu1 %v604_v13, %s2532_s13 }
 0x614   :  { %v703_v14 = vpop.permute.xlu0 %702 }
 0x615   :  { %v597_v16 = vpop.permute.xlu1 %596  ;;  %v705_v18 = vmul.f32 %v703_v14, %v700_v59 }
 0x616   :  { %v599_v19 = vmul.f32 %v597_v16, %v594_v7 }
 0x618   :  { %v713_v20 = vpop.permute.xlu0 %712 }
 0x619   :  { %v715_v21 = vadd.f32 %v713_v20, %v705_v18  ;;  %v607_v23 = vpop.permute.xlu1 %606 }
 0x61a   :  { %v609_v24 = vadd.f32 %v607_v23, %v599_v19  ;;  %v152_v23 = vadd.f32 %v2613_v15, %v2711_v61 }
 0x61b   :  { %2479 = vtanh.f32 %v715_v21 }
 0x61c   :  { %2481 = vtanh.f32 %v609_v24 }
 0x625   :  { %v2480_v17 = vpop.eup %2479 }
 0x626   :  { %v2482_v25 = vpop.eup %2481  ;;  %718 = vrot.lane.b32.xlu0 %v2480_v17, %s2532_s13 }
 0x627   :  { %612 = vrot.lane.b32.xlu1 %v2482_v25, %s2532_s13 }
 0x698   :  { %v719_v26 = vpop.permute.xlu0 %718 }
 0x699   :  { %v721_v27 = vmul.f32 %v719_v26, %v700_v59  ;;  %v613_v29 = vpop.permute.xlu1 %612 }
 0x69a   :  { %v2793_v30 = vmul.f32 %v613_v29, %v594_v7 }
 0x69b   :  { %723 = vrot.lane.b32.xlu1 %v721_v27, %s2531_s2 }
 0x69c   :  { %726 = vrot.lane.b32.xlu0 %v2793_v30, %s2533_s14 }
 0x69f   :  { %813 = vrot.lane.b32.xlu1 %v609_v24, %s2533_s14 }
 0x6a0   :  { %919 = vrot.lane.b32.xlu0 %v715_v21, %s2533_s14 }
 0x70d   :  { %v724_v31 = vpop.permute.xlu1 %723 }
 0x70e   :  { %2167 = vmatmul.mubr.msk.f32.vlgmr.msra.gmra.mrb[4].mxu1 %vm209_vm3, %v724_v31  ;;  %v727_v32 = vpop.permute.xlu0 %726 }
 0x70f   :  { %v729_v33 = vsel %vm209_vm3, %v724_v31, %v727_v32  ;;  %2374 = vmatpush3.bf16.msra.mxu1 %v2648_v43  ;;  %2185 = vmatprep.mubr.msk.f32.mxu1 %vm2528_vm1, %v2529_v4 }
 0x710   :  { %2156 = vmatmul.mubr.msk.f32.vlgmr.msra.gmra.mrb[14].mxu0 %vm310_vm4, %v729_v33  ;;  %2375 = vmatprep.subr.bf16.mxu1 %v2527_v0 }
 0x711   :  { %2386 = vmatpush3.bf16.msra.mxu0 %v2587_v8  ;;  %2196 = vmatprep.mubr.msk.f32.mxu0 %vm2528_vm1, %v2529_v4  ;;  %v814_v54 = vpop.permute.xlu1 %813 }
 0x712   :  { %2387 = vmatprep.subr.bf16.mxu0 %v2527_v0  ;;  %v920_v52 = vpop.permute.xlu0 %919 }
 0x713   :  { %2377 = vmatpush3.bf16.msra.mxu1 %v2659_v46 }
 0x714   :  { %2378 = vmatprep.subr.bf16.mxu1 %v2527_v0 }
 0x715   :  { %2389 = vmatpush3.bf16.msra.mxu0 %v2600_v12 }
 0x716   :  { %2390 = vmatprep.subr.bf16.mxu0 %v2527_v0 }
 0x717   :  { %2380 = vmatpush3.bf16.msra.mxu1 %v2679_v51 }
 0x718   :  { %2381 = vmatprep.subr.bf16.mxu1 %v2527_v0 }
 0x71b   :  { %2383 = vmatpush3.bf16.msra.mxu1 %v2695_v55 }
 0x71c   :  { %2402 = vmatprep.subr.bf16.mxu1 %v2527_v0 }
 0x7e1   :  { %v904_v35 = vpop.f32.mrb[4].mxu1 }
 0x7e2   :  { %v908_v36 = vadd.f32 %v904_v35, %v147_v34  ;;  %v2168_v37 = vpop.f32.mrb[5].mxu1 }
 0x7e3   :  { %v799_v38 = vpop.f32.mrb[14].mxu0 }
 0x7e4   :  { %v909_v40 = vmul.f32 %v908_v36, %v2618_v22  ;;  %v800_v41 = vadd.f32 %v2735_v3, %v799_v38  ;;  %v2157_v42 = vpop.f32.mrb[15].mxu0 }
 0x7e6   :  { %2483 = vtanh.f32 %v909_v40  ;;  %v803_v44 = vmul.f32 %v800_v41, %v2618_v22 }
 0x7e8   :  { %2485 = vtanh.f32 %v803_v44 }
 0x7f0   :  { %v2484_v45 = vpop.eup %2483 }
 0x7f1   :  { %v911_v47 = vmul.f32 %v2484_v45, %v2618_v22 }
 0x7f2   :  { %v2486_v48 = vpop.eup %2485 }
 0x7f3   :  { %v912_v49 = vadd.f32 %v911_v47, %v2622_v28  ;;  %v805_v58 = vmul.f32 %v2486_v48, %v2618_v22 }
 0x7f5   :  { %914 = vrot.lane.b32.xlu0 %v912_v49, %s2531_s2  ;;  %v806_v50 = vadd.f32 %v805_v58, %v2622_v28  ;;  %v922_v53 = vmul.f32 %v920_v52, %v912_v49 }
 0x7f7   :  { %808 = vrot.lane.b32.xlu1 %v806_v50, %s2531_s2  ;;  %v816_v56 = vmul.f32 %v814_v54, %v806_v50 }
 0x7f9   :  { %924 = vrot.lane.b32.xlu0 %v922_v53, %s2532_s13 }
 0x7fb   :  { %818 = vrot.lane.b32.xlu1 %v816_v56, %s2532_s13 }
 0x867   :  { %v915_v57 = vpop.permute.xlu0 %914 }
 0x868   :  { %v917_v2 = vmul.f32 %v915_v57, %v912_v49 }
 0x869   :  { %v809_v1 = vpop.permute.xlu1 %808 }
 0x86a   :  { %v811_v6 = vmul.f32 %v809_v1, %v806_v50 }
 0x86b   :  { %v925_v5 = vpop.permute.xlu0 %924 }
 0x86c   :  { %v927_v59 = vadd.f32 %v925_v5, %v917_v2 }
 0x86d   :  { %v819_v7 = vpop.permute.xlu1 %818 }
 0x86e   :  { %2487 = vtanh.f32 %v927_v59  ;;  %v821_v9 = vadd.f32 %v819_v7, %v811_v6  ;;  %v157_v7 = vadd.f32 %v2709_v60, %v2613_v15 }
 0x870   :  { %2489 = vtanh.f32 %v821_v9 }
 0x878   :  { %v2488_v10 = vpop.eup %2487 }
 0x879   :  { %930 = vrot.lane.b32.xlu0 %v2488_v10, %s2532_s13 }
 0x87a   :  { %v2490_v11 = vpop.eup %2489 }
 0x87b   :  { %824 = vrot.lane.b32.xlu1 %v2490_v11, %s2532_s13 }
 0x8eb   :  { %v931_v13 = vpop.permute.xlu0 %930 }
 0x8ec   :  { %v933_v14 = vmul.f32 %v931_v13, %v912_v49 }
 0x8ed   :  { %v825_v16 = vpop.permute.xlu1 %824 }
 0x8ee   :  { %v2834_v18 = vmul.f32 %v825_v16, %v806_v50  ;;  %935 = vrot.lane.b32.xlu1 %v933_v14, %s2531_s2 }
 0x8f0   :  { %938 = vrot.lane.b32.xlu0 %v2834_v18, %s2533_s14 }
 0x8f2   :  { %1025 = vrot.lane.b32.xlu1 %v821_v9, %s2533_s14 }
 0x8f4   :  { %1131 = vrot.lane.b32.xlu0 %v927_v59, %s2533_s14 }
 0x960   :  { %v936_v19 = vpop.permute.xlu1 %935 }
 0x961   :  { %2197 = vmatmul.mubr.msk.f32.vlgmr.msra.gmra.mrb[16].mxu0 %vm209_vm3, %v936_v19 }
 0x962   :  { %v939_v20 = vpop.permute.xlu0 %938  ;;  %2392 = vmatpush3.bf16.msra.mxu0 %v2648_v43  ;;  %2215 = vmatprep.mubr.msk.f32.mxu0 %vm2528_vm1, %v2529_v4 }
 0x963   :  { %v941_v21 = vsel %vm209_vm3, %v936_v19, %v939_v20  ;;  %2393 = vmatprep.subr.bf16.mxu0 %v2527_v0 }
 0x964   :  { %2186 = vmatmul.mubr.msk.f32.vlgmr.msra.gmra.mrb[6].mxu1 %vm310_vm4, %v941_v21  ;;  %v1026_v41 = vpop.permute.xlu1 %1025 }
 0x965   :  { %2404 = vmatpush3.bf16.msra.mxu1 %v2587_v8  ;;  %2226 = vmatprep.mubr.msk.f32.mxu1 %vm2528_vm1, %v2529_v4 }
 0x966   :  { %2395 = vmatpush3.bf16.msra.mxu0 %v2659_v46  ;;  %2405 = vmatprep.subr.bf16.mxu1 %v2527_v0  ;;  %v1132_v37 = vpop.permute.xlu0 %1131 }
 0x967   :  { %2396 = vmatprep.subr.bf16.mxu0 %v2527_v0 }
 0x969   :  { %2407 = vmatpush3.bf16.msra.mxu1 %v2600_v12 }
 0x96a   :  { %2398 = vmatpush3.bf16.msra.mxu0 %v2679_v51  ;;  %2408 = vmatprep.subr.bf16.mxu1 %v2527_v0 }
 0x96b   :  { %2399 = vmatprep.subr.bf16.mxu0 %v2527_v0 }
 0x96e   :  { %2401 = vmatpush3.bf16.msra.mxu0 %v2695_v55 }
 0x96f   :  { %2420 = vmatprep.subr.bf16.mxu0 %v2527_v0 }
 0xa34   :  { %v1116_v24 = vpop.f32.mrb[16].mxu0 }
 0xa35   :  { %v1120_v17 = vadd.f32 %v1116_v24, %v152_v23  ;;  %v2198_v25 = vpop.f32.mrb[17].mxu0 }
 0xa37   :  { %v1121_v26 = vmul.f32 %v1120_v17, %v2618_v22  ;;  %v1011_v27 = vpop.f32.mrb[6].mxu1 }
 0xa38   :  { %v1012_v29 = vadd.f32 %v2735_v3, %v1011_v27  ;;  %v2187_v31 = vpop.f32.mrb[7].mxu1 }
 0xa39   :  { %2491 = vtanh.f32 %v1121_v26 }
 0xa3a   :  { %v1015_v32 = vmul.f32 %v1012_v29, %v2618_v22 }
 0xa3c   :  { %2493 = vtanh.f32 %v1015_v32 }
 0xa43   :  { %v2492_v33 = vpop.eup %2491 }
 0xa44   :  { %v1123_v34 = vmul.f32 %v2492_v33, %v2618_v22 }
 0xa46   :  { %v2494_v35 = vpop.eup %2493  ;;  %v1124_v36 = vadd.f32 %v1123_v34, %v2622_v28 }
 0xa47   :  { %v1017_v61 = vmul.f32 %v2494_v35, %v2618_v22 }
 0xa48   :  { %1126 = vrot.lane.b32.xlu0 %v1124_v36, %s2531_s2  ;;  %v1134_v40 = vmul.f32 %v1132_v37, %v1124_v36 }
 0xa49   :  { %v1018_v38 = vadd.f32 %v1017_v61, %v2622_v28 }
 0xa4b   :  { %1020 = vrot.lane.b32.xlu1 %v1018_v38, %s2531_s2  ;;  %v1028_v42 = vmul.f32 %v1026_v41, %v1018_v38 }
 0xa4c   :  { %1136 = vrot.lane.b32.xlu0 %v1134_v40, %s2532_s13 }
 0xa4f   :  { %1030 = vrot.lane.b32.xlu1 %v1028_v42, %s2532_s13 }
 0xaba   :  { %v1127_v44 = vpop.permute.xlu0 %1126 }
 0xabb   :  { %v1129_v45 = vmul.f32 %v1127_v44, %v1124_v36 }
 0xabd   :  { %v1021_v47 = vpop.permute.xlu1 %1020 }
 0xabe   :  { %v1137_v48 = vpop.permute.xlu0 %1136  ;;  %v1023_v58 = vmul.f32 %v1021_v47, %v1018_v38 }
 0xabf   :  { %v1139_v49 = vadd.f32 %v1137_v48, %v1129_v45 }
 0xac1   :  { %2495 = vtanh.f32 %v1139_v49  ;;  %v1031_v50 = vpop.permute.xlu1 %1030 }
 0xac2   :  { %v1033_v52 = vadd.f32 %v1031_v50, %v1023_v58 }
 0xac4   :  { %2497 = vtanh.f32 %v1033_v52 }
 0xacb   :  { %v2496_v53 = vpop.eup %2495 }
 0xacc   :  { %1142 = vrot.lane.b32.xlu0 %v2496_v53, %s2532_s13 }
 0xace   :  { %v2498_v54 = vpop.eup %2497 }
 0xacf   :  { %1036 = vrot.lane.b32.xlu1 %v2498_v54, %s2532_s13 }
 0xb3e   :  { %v1143_v56 = vpop.permute.xlu0 %1142 }
 0xb3f   :  { %v1145_v57 = vmul.f32 %v1143_v56, %v1124_v36 }
 0xb41   :  { %v1037_v1 = vpop.permute.xlu1 %1036  ;;  %1147 = vrot.lane.b32.xlu1 %v1145_v57, %s2531_s2 }
 0xb42   :  { %v2876_v2 = vmul.f32 %v1037_v1, %v1018_v38 }
 0xb44   :  { %1150 = vrot.lane.b32.xlu0 %v2876_v2, %s2533_s14 }
 0xb45   :  { %1237 = vrot.lane.b32.xlu1 %v1033_v52, %s2533_s14 }
 0xb48   :  { %1343 = vrot.lane.b32.xlu0 %v1139_v49, %s2533_s14 }
 0xbb3   :  { %v1148_v5 = vpop.permute.xlu1 %1147 }
 0xbb4   :  { %2227 = vmatmul.mubr.msk.f32.vlgmr.msra.gmra.mrb[8].mxu1 %vm209_vm3, %v1148_v5 }
 0xbb5   :  { %2410 = vmatpush3.bf16.msra.mxu1 %v2648_v43  ;;  %2245 = vmatprep.mubr.msk.f32.mxu1 %vm2528_vm1, %v2529_v4 }
 0xbb6   :  { %v1151_v6 = vpop.permute.xlu0 %1150  ;;  %2411 = vmatprep.subr.bf16.mxu1 %v2527_v0 }
 0xbb7   :  { %v1153_v59 = vsel %vm209_vm3, %v1148_v5, %v1151_v6  ;;  %v1238_v29 = vpop.permute.xlu1 %1237 }
 0xbb8   :  { %2216 = vmatmul.mubr.msk.f32.vlgmr.msra.gmra.mrb[18].mxu0 %vm310_vm4, %v1153_v59 }
 0xbb9   :  { %2422 = vmatpush3.bf16.msra.mxu0 %v2587_v8  ;;  %2413 = vmatpush3.bf16.msra.mxu1 %v2659_v46 }
 0xbba   :  { %2423 = vmatprep.subr.bf16.mxu0 %v2527_v0  ;;  %2414 = vmatprep.subr.bf16.mxu1 %v2527_v0  ;;  %v1344_v25 = vpop.permute.xlu0 %1343 }
 0xbbb   :  { %2256 = vmatprep.mubr.msk.f32.mxu0 %vm2528_vm1, %v2529_v4 }
 0xbbd   :  { %2425 = vmatpush3.bf16.msra.mxu0 %v2600_v12  ;;  %2416 = vmatpush3.bf16.msra.mxu1 %v2679_v51 }
 0xbbe   :  { %2417 = vmatprep.subr.bf16.mxu1 %v2527_v0  ;;  %2426 = vmatprep.subr.bf16.mxu0 %v2527_v0 }
 0xbc1   :  { %2419 = vmatpush3.bf16.msra.mxu1 %v2695_v55 }
 0xbc2   :  { %2438 = vmatprep.subr.bf16.mxu1 %v2527_v0 }
 0xc87   :  { %v1328_v9 = vpop.f32.mrb[8].mxu1 }
 0xc88   :  { %v1332_v10 = vadd.f32 %v1328_v9, %v157_v7  ;;  %v2228_v11 = vpop.f32.mrb[9].mxu1 }
 0xc8a   :  { %v1333_v13 = vmul.f32 %v1332_v10, %v2618_v22 }
 0xc8b   :  { %v1223_v14 = vpop.f32.mrb[18].mxu0 }
 0xc8c   :  { %2499 = vtanh.f32 %v1333_v13  ;;  %v1224_v16 = vadd.f32 %v2735_v3, %v1223_v14  ;;  %v2217_v19 = vpop.f32.mrb[19].mxu0 }
 0xc8e   :  { %v1227_v20 = vmul.f32 %v1224_v16, %v2618_v22 }
 0xc90   :  { %2501 = vtanh.f32 %v1227_v20 }
 0xc96   :  { %v2500_v21 = vpop.eup %2499 }
 0xc97   :  { %v1335_v23 = vmul.f32 %v2500_v21, %v2618_v22 }
 0xc99   :  { %v1336_v24 = vadd.f32 %v1335_v23, %v2622_v28 }
 0xc9a   :  { %v2502_v17 = vpop.eup %2501 }
 0xc9b   :  { %1338 = vrot.lane.b32.xlu0 %v1336_v24, %s2531_s2  ;;  %v1229_v60 = vmul.f32 %v2502_v17, %v2618_v22  ;;  %v1346_v26 = vmul.f32 %v1344_v25, %v1336_v24 }
 0xc9d   :  { %v1230_v27 = vadd.f32 %v1229_v60, %v2622_v28 }
 0xc9f   :  { %1348 = vrot.lane.b32.xlu0 %v1346_v26, %s2532_s13  ;;  %1232 = vrot.lane.b32.xlu1 %v1230_v27, %s2531_s2  ;;  %v1240_v31 = vmul.f32 %v1238_v29, %v1230_v27 }
 0xca3   :  { %1242 = vrot.lane.b32.xlu1 %v1240_v31, %s2532_s13 }
 0xd0d   :  { %v1339_v32 = vpop.permute.xlu0 %1338 }
 0xd0e   :  { %v1341_v33 = vmul.f32 %v1339_v32, %v1336_v24 }
 0xd11   :  { %v1349_v34 = vpop.permute.xlu0 %1348  ;;  %v1233_v35 = vpop.permute.xlu1 %1232 }
 0xd12   :  { %v1351_v36 = vadd.f32 %v1349_v34, %v1341_v33  ;;  %v1235_v61 = vmul.f32 %v1233_v35, %v1230_v27 }
 0xd14   :  { %2503 = vtanh.f32 %v1351_v36 }
 0xd15   :  { %v1243_v37 = vpop.permute.xlu1 %1242 }
 0xd16   :  { %v1245_v38 = vadd.f32 %v1243_v37, %v1235_v61 }
 0xd18   :  { %2505 = vtanh.f32 %v1245_v38 }
 0xd1e   :  { %v2504_v40 = vpop.eup %2503 }
 0xd1f   :  { %1354 = vrot.lane.b32.xlu0 %v2504_v40, %s2532_s13 }
 0xd22   :  { %v2506_v41 = vpop.eup %2505 }
 0xd23   :  { %1248 = vrot.lane.b32.xlu1 %v2506_v41, %s2532_s13 }
 0xd91   :  { %v1355_v42 = vpop.permute.xlu0 %1354 }
 0xd92   :  { %v1357_v44 = vmul.f32 %v1355_v42, %v1336_v24 }
 0xd94   :  { %1359 = vrot.lane.b32.xlu1 %v1357_v44, %s2531_s2 }
 0xd95   :  { %v1249_v45 = vpop.permute.xlu1 %1248 }
 0xd96   :  { %v2917_v47 = vmul.f32 %v1249_v45, %v1230_v27 }
 0xd98   :  { %1449 = vrot.lane.b32.xlu1 %v1245_v38, %s2533_s14  ;;  %1362 = vrot.lane.b32.xlu0 %v2917_v47, %s2533_s14 }
 0xd9c   :  { %1555 = vrot.lane.b32.xlu0 %v1351_v36, %s2533_s14 }
 0xe06   :  { %v1360_v48 = vpop.permute.xlu1 %1359 }
 0xe07   :  { %2257 = vmatmul.mubr.msk.f32.vlgmr.msra.gmra.mrb[20].mxu0 %vm209_vm3, %v1360_v48 }
 0xe08   :  { %2428 = vmatpush3.bf16.msra.mxu0 %v2648_v43  ;;  %2275 = vmatprep.mubr.msk.f32.mxu0 %vm2528_vm1, %v2529_v4 }
 0xe09   :  { %2429 = vmatprep.subr.bf16.mxu0 %v2527_v0 }
 0xe0a   :  { %v1363_v49 = vpop.permute.xlu0 %1362  ;;  %v1450_v13 = vpop.permute.xlu1 %1449 }
 0xe0b   :  { %v1365_v58 = vsel %vm209_vm3, %v1360_v48, %v1363_v49 }
 0xe0c   :  { %2246 = vmatmul.mubr.msk.f32.vlgmr.msra.gmra.mrb[10].mxu1 %vm310_vm4, %v1365_v58  ;;  %2431 = vmatpush3.bf16.msra.mxu0 %v2659_v46 }
 0xe0d   :  { %2440 = vmatpush3.bf16.msra.mxu1 %v2587_v8  ;;  %2432 = vmatprep.subr.bf16.mxu0 %v2527_v0  ;;  %v162_v8 = vadd.f32 %v2613_v15, %v2715_v63 }
 0xe0e   :  { %2441 = vmatprep.subr.bf16.mxu1 %v2527_v0  ;;  %2286 = vmatprep.mubr.msk.f32.mxu1 %vm2528_vm1, %v2529_v4  ;;  %v1556_v63 = vpop.permute.xlu0 %1555 }
 0xe10   :  { %2434 = vmatpush3.bf16.msra.mxu0 %v2679_v51 }
 0xe11   :  { %2443 = vmatpush3.bf16.msra.mxu1 %v2600_v12  ;;  %2435 = vmatprep.subr.bf16.mxu0 %v2527_v0 }
 0xe12   :  { %2444 = vmatprep.subr.bf16.mxu1 %v2527_v0 }
 0xe14   :  { %2437 = vmatpush3.bf16.msra.mxu0 %v2695_v55 }
 0xeda   :  { %v1540_v50 = vpop.f32.mrb[20].mxu0 }
 0xedb   :  { %v1544_v52 = vadd.f32 %v1540_v50, %v162_v8  ;;  %v2258_v53 = vpop.f32.mrb[21].mxu0 }
 0xedd   :  { %v1545_v54 = vmul.f32 %v1544_v52, %v2618_v22 }
 0xedf   :  { %2507 = vtanh.f32 %v1545_v54  ;;  %v1435_v56 = vpop.f32.mrb[10].mxu1 }
 0xee0   :  { %v1436_v57 = vadd.f32 %v2735_v3, %v1435_v56  ;;  %v2247_v1 = vpop.f32.mrb[11].mxu1 }
 0xee2   :  { %v1439_v12 = vmul.f32 %v1436_v57, %v2618_v22 }
 0xee4   :  { %2509 = vtanh.f32 %v1439_v12 }
 0xee9   :  { %v2508_v5 = vpop.eup %2507 }
 0xeea   :  { %v1547_v6 = vmul.f32 %v2508_v5, %v2618_v22 }
 0xeec   :  { %v1548_v59 = vadd.f32 %v1547_v6, %v2622_v28 }
 0xeee   :  { %v2510_v7 = vpop.eup %2509  ;;  %1550 = vrot.lane.b32.xlu0 %v1548_v59, %s2531_s2  ;;  %v1558_v10 = vmul.f32 %v1556_v63, %v1548_v59 }
 0xeef   :  { %v1441_v9 = vmul.f32 %v2510_v7, %v2618_v22 }
 0xef1   :  { %v1442_v11 = vadd.f32 %v1441_v9, %v2622_v28 }
 0xef2   :  { %1560 = vrot.lane.b32.xlu0 %v1558_v10, %s2532_s13 }
 0xef3   :  { %1444 = vrot.lane.b32.xlu1 %v1442_v11, %s2531_s2  ;;  %v1452_v14 = vmul.f32 %v1450_v13, %v1442_v11 }
 0xef7   :  { %1454 = vrot.lane.b32.xlu1 %v1452_v14, %s2532_s13 }
 0xf60   :  { %v1551_v16 = vpop.permute.xlu0 %1550 }
 0xf61   :  { %v1553_v19 = vmul.f32 %v1551_v16, %v1548_v59 }
 0xf64   :  { %v1561_v20 = vpop.permute.xlu0 %1560 }
 0xf65   :  { %v1563_v21 = vadd.f32 %v1561_v20, %v1553_v19  ;;  %v1445_v23 = vpop.permute.xlu1 %1444 }
 0xf66   :  { %v1447_v24 = vmul.f32 %v1445_v23, %v1442_v11 }
 0xf67   :  { %2511 = vtanh.f32 %v1563_v21 }
 0xf69   :  { %v1455_v17 = vpop.permute.xlu1 %1454 }
 0xf6a   :  { %v1457_v60 = vadd.f32 %v1455_v17, %v1447_v24 }
 0xf6c   :  { %2513 = vtanh.f32 %v1457_v60 }
 0xf71   :  { %v2512_v25 = vpop.eup %2511 }
 0xf72   :  { %1566 = vrot.lane.b32.xlu0 %v2512_v25, %s2532_s13 }
 0xf76   :  { %v2514_v26 = vpop.eup %2513 }
 0xf77   :  { %1460 = vrot.lane.b32.xlu1 %v2514_v26, %s2532_s13 }
 0xfe4   :  { %v1567_v27 = vpop.permute.xlu0 %1566 }
 0xfe5   :  { %v1569_v29 = vmul.f32 %v1567_v27, %v1548_v59 }
 0xfe7   :  { %1571 = vrot.lane.b32.xlu1 %v1569_v29, %s2531_s2 }
 0xfe9   :  { %v1461_v31 = vpop.permute.xlu1 %1460 }
 0xfea   :  { %v2957_v32 = vmul.f32 %v1461_v31, %v1442_v11 }
 0xfeb   :  { %1661 = vrot.lane.b32.xlu1 %v1457_v60, %s2533_s14 }
 0xfec   :  { %1574 = vrot.lane.b32.xlu0 %v2957_v32, %s2533_s14 }
 0xff0   :  { %1767 = vrot.lane.b32.xlu0 %v1563_v21, %s2533_s14 }
0x1059   :  { %v1572_v33 = vpop.permute.xlu1 %1571 }
0x105a   :  { %2287 = vmatmul.mubr.msk.f32.vlgmr.msra.gmra.mrb[12].mxu1 %vm209_vm3, %v1572_v33 }
0x105b   :  { %2446 = vmatpush3.bf16.msra.mxu1 %v2648_v43  ;;  %2305 = vmatprep.mubr.msk.f32.mxu1 %vm2528_vm1, %v2529_v4  ;;  %v167_v4 = vadd.f32 %v2713_v62, %v2613_v15 }
0x105c   :  { %2447 = vmatprep.subr.bf16.mxu1 %v2527_v0 }
0x105d   :  { %v1662_v48 = vpop.permute.xlu1 %1661 }
0x105e   :  { %v1575_v34 = vpop.permute.xlu0 %1574 }
0x105f   :  { %v1577_v35 = vsel %vm209_vm3, %v1572_v33, %v1575_v34  ;;  %2449 = vmatpush3.bf16.msra.mxu1 %v2659_v46 }
0x1060   :  { %2276 = vmatmul.mubr.msk.f32.vlgmr.msra.gmra.mrb[22].mxu0 %vm310_vm4, %v1577_v35  ;;  %2450 = vmatprep.subr.bf16.mxu1 %v2527_v0 }
0x1062   :  { %v1768_v62 = vpop.permute.xlu0 %1767 }
0x1063   :  { %2452 = vmatpush3.bf16.msra.mxu1 %v2679_v51 }
0x1064   :  { %2453 = vmatprep.subr.bf16.mxu1 %v2527_v0 }
0x1067   :  { %2455 = vmatpush3.bf16.msra.mxu1 %v2695_v55 }
0x112d   :  { %v1752_v43 = vpop.f32.mrb[12].mxu1 }
0x112e   :  { %v1756_v36 = vadd.f32 %v1752_v43, %v167_v4  ;;  %v2288_v61 = vpop.f32.mrb[13].mxu1 }
0x1130   :  { %v1757_v37 = vmul.f32 %v1756_v36, %v2618_v22 }
0x1132   :  { %2515 = vtanh.f32 %v1757_v37 }
0x1133   :  { %v1647_v46 = vpop.f32.mrb[22].mxu0 }
0x1134   :  { %v1648_v38 = vadd.f32 %v2735_v3, %v1647_v46  ;;  %v2277_v40 = vpop.f32.mrb[23].mxu0 }
0x1136   :  { %v1651_v41 = vmul.f32 %v1648_v38, %v2618_v22 }
0x1138   :  { %2517 = vtanh.f32 %v1651_v41 }
0x113c   :  { %v2516_v51 = vpop.eup %2515 }
0x113d   :  { %v1759_v0 = vmul.f32 %v2516_v51, %v2618_v22 }
0x113f   :  { %v1760_v55 = vadd.f32 %v1759_v0, %v2622_v28 }
0x1141   :  { %1762 = vrot.lane.b32.xlu0 %v1760_v55, %s2531_s2  ;;  %v1770_v42 = vmul.f32 %v1768_v62, %v1760_v55 }
0x1142   :  { %v2518_v15 = vpop.eup %2517 }
0x1143   :  { %v1653_v44 = vmul.f32 %v2518_v15, %v2618_v22 }
0x1145   :  { %1772 = vrot.lane.b32.xlu0 %v1770_v42, %s2532_s13  ;;  %v1654_v45 = vadd.f32 %v1653_v44, %v2622_v28 }
0x1147   :  { %1656 = vrot.lane.b32.xlu1 %v1654_v45, %s2531_s2  ;;  %v1664_v49 = vmul.f32 %v1662_v48, %v1654_v45 }
0x114b   :  { %1666 = vrot.lane.b32.xlu1 %v1664_v49, %s2532_s13 }
0x11b3   :  { %v1763_v58 = vpop.permute.xlu0 %1762 }
0x11b4   :  { %v1765_v8 = vmul.f32 %v1763_v58, %v1760_v55 }
0x11b7   :  { %v1773_v50 = vpop.permute.xlu0 %1772 }
0x11b8   :  { %v1775_v52 = vadd.f32 %v1773_v50, %v1765_v8 }
0x11b9   :  { %v1657_v53 = vpop.permute.xlu1 %1656 }
0x11ba   :  { %2519 = vtanh.f32 %v1775_v52  ;;  %v1659_v54 = vmul.f32 %v1657_v53, %v1654_v45 }
0x11bd   :  { %v1667_v56 = vpop.permute.xlu1 %1666 }
0x11be   :  { %v1669_v57 = vadd.f32 %v1667_v56, %v1659_v54 }
0x11c0   :  { %2521 = vtanh.f32 %v1669_v57 }
0x11c4   :  { %v2520_v1 = vpop.eup %2519 }
0x11c5   :  { %1778 = vrot.lane.b32.xlu0 %v2520_v1, %s2532_s13 }
0x11ca   :  { %v2522_v12 = vpop.eup %2521 }
0x11cb   :  { %1672 = vrot.lane.b32.xlu1 %v2522_v12, %s2532_s13 }
0x1237   :  { %v1779_v5 = vpop.permute.xlu0 %1778 }
0x1238   :  { %v1781_v6 = vmul.f32 %v1779_v5, %v1760_v55 }
0x123a   :  { %1783 = vrot.lane.b32.xlu1 %v1781_v6, %s2531_s2 }
0x123d   :  { %v1673_v59 = vpop.permute.xlu1 %1672 }
0x123e   :  { %v1675_v7 = vmul.f32 %v1673_v59, %v1654_v45  ;;  %1873 = vrot.lane.b32.xlu1 %v1669_v57, %s2533_s14 }
0x1240   :  { %1786 = vrot.lane.b32.xlu0 %v1675_v7, %s2533_s14 }
0x12ac   :  { %v1784_v63 = vpop.permute.xlu1 %1783 }
0x12b0   :  { %v1874_v23 = vpop.permute.xlu1 %1873 }
0x12b2   :  { %v1787_v9 = vpop.permute.xlu0 %1786 }
0x12b3   :  { %v1789_v10 = vsel %vm209_vm3, %v1784_v63, %v1787_v9 }
0x12b4   :  { %2306 = vmatmul.mubr.msk.f32.vlgmr.msra.gmra.mrb[14].mxu1 %vm310_vm4, %v1789_v10 }
0x1387   :  { %v1859_v11 = vpop.f32.mrb[14].mxu1 }
0x1388   :  { %v1860_v13 = vadd.f32 %v2735_v3, %v1859_v11  ;;  %v2307_v14 = vpop.f32.mrb[15].mxu1 }
0x138a   :  { %v1863_v16 = vmul.f32 %v1860_v13, %v2618_v22 }
0x138c   :  { %2523 = vtanh.f32 %v1863_v16 }
0x1396   :  { %v2524_v19 = vpop.eup %2523 }
0x1397   :  { %v1865_v20 = vmul.f32 %v2524_v19, %v2618_v22 }
0x1399   :  { %v1866_v21 = vadd.f32 %v1865_v20, %v2622_v28 }
0x139b   :  { %1868 = vrot.lane.b32.xlu0 %v1866_v21, %s2531_s2  ;;  %v1876_v24 = vmul.f32 %v1874_v23, %v1866_v21 }
0x139d   :  { %1878 = vrot.lane.b32.xlu1 %v1876_v24, %s2532_s13 }
0x13a1   :  { %406 = vrot.lane.b32.xlu1 %v2752_v39, %s2531_s2 }
0x13a5   :  { %829 = vrot.lane.b32.xlu1 %v2834_v18, %s2531_s2 }
0x13a9   :  { %1253 = vrot.lane.b32.xlu1 %v2917_v47, %s2531_s2 }
0x13ad   :  { %1677 = vrot.lane.b32.xlu1 %v1675_v7, %s2531_s2 }
0x140d   :  { %v1869_v22 = vpop.permute.xlu0 %1868 }
0x140e   :  { %v1871_v3 = vmul.f32 %v1869_v22, %v1866_v21 }
0x140f   :  { %v1879_v28 = vpop.permute.xlu1 %1878 }
0x1410   :  { %v1881_v17 = vadd.f32 %v1879_v28, %v1871_v3 }
0x1412   :  { %2525 = vtanh.f32 %v1881_v17 }
0x1413   :  { %v407_v60 = vpop.permute.xlu1 %406 }
0x1414   :  { %409 = vst.msk [vmem:[%s3054_s6] sm:$0xff] %vm209_vm3, %v407_v60 }
0x1417   :  { %v830_v39 = vpop.permute.xlu1 %829 }
0x1418   :  { %1914 = vst.msk [vmem:[%s3054_s6 + $0x10] sm:$0xff] %vm209_vm3, %v830_v39 }
0x141b   :  { %v1254_v18 = vpop.permute.xlu1 %1253 }
0x141c   :  { %v2526_v47 = vpop.eup %2525  ;;  %1920 = vst.msk [vmem:[%s3054_s6 + $0x20] sm:$0xff] %vm209_vm3, %v1254_v18 }
0x141d   :  { %1884 = vrot.lane.b32.xlu0 %v2526_v47, %s2532_s13 }
0x141f   :  { %v1678_v25 = vpop.permute.xlu1 %1677 }
0x1420   :  { %1926 = vst.msk [vmem:[%s3054_s6 + $0x30] sm:$0xff] %vm209_vm3, %v1678_v25 }
0x1421   :  { %617 = vrot.lane.b32.xlu0 %v2793_v30, %s2531_s2 }
0x1425   :  { %1041 = vrot.lane.b32.xlu0 %v2876_v2, %s2531_s2 }
0x1429   :  { %1465 = vrot.lane.b32.xlu0 %v2957_v32, %s2531_s2 }
0x148f   :  { %v1885_v26 = vpop.permute.xlu0 %1884 }
0x1490   :  { %v1887_v27 = vmul.f32 %v1885_v26, %v1866_v21 }
0x1492   :  { %1889 = vrot.lane.b32.xlu0 %v1887_v27, %s2531_s2 }
0x1493   :  { %v618_v29 = vpop.permute.xlu0 %617 }
0x1494   :  { %1911 = vst.msk [vmem:[%s3054_s6 + $0x8] sm:$0xff] %vm209_vm3, %v618_v29 }
0x1497   :  { %v1042_v31 = vpop.permute.xlu0 %1041 }
0x1498   :  { %1917 = vst.msk [vmem:[%s3054_s6 + $0x18] sm:$0xff] %vm209_vm3, %v1042_v31 }
0x149b   :  { %v1466_v30 = vpop.permute.xlu0 %1465 }
0x149c   :  { %1923 = vst.msk [vmem:[%s3054_s6 + $0x28] sm:$0xff] %vm209_vm3, %v1466_v30 }
0x1504   :  { %v1890_v2 = vpop.permute.xlu0 %1889 }
0x1505   :  { %1929 = vst.msk [vmem:[%s3054_s6 + $0x38] sm:$0xff] %vm209_vm3, %v1890_v2 }

</bundles_post_ra>
